<compile_context>
chip_gen: v5e
topology: v5e:2x2
jax: 0.10.0
libtpu: 0.0.40
codegen_flags: <defaults>
</compile_context>

<pallas_src>
import functools

import jax
import jax.numpy as jnp
from jax.experimental import pallas as pl
from jax.experimental.pallas import tpu as pltpu


def _round_up(x, m):
    return (x + m - 1) // m * m


def _pick_tile_h(out_h, n_batch, out_fold, acc_budget_bytes=2 << 20):
    """Output-row tile height.

    Largest divisor of out_h whose f32 accumulator (tile_h x out_fold) fits the
    budget, restricted to sublane-friendly sizes (multiple of 8 or the full
    height).  A per-image split is only forced when the batch axis alone would
    give < 2 total grid steps (pipelining / megacore), per the perf review.
    """
    max_rows = max(1, acc_budget_bytes // max(1, out_fold * 4))
    cands = [d for d in range(1, out_h + 1)
             if out_h % d == 0 and (d == out_h or d % 8 == 0)]
    fitting = [d for d in cands if d <= max_rows]
    tile = max(fitting) if fitting else min(cands)
    if n_batch * (out_h // tile) < 2:
        smaller = [d for d in (fitting or cands) if d < out_h]
        if smaller:
            tile = max(smaller)
    return tile


def _build_banded_weight(weight_oihw, out_w, w_in_cols, s_w, dtype):
    """Expand the OIHW conv weight into per-vertical-tap banded matrices.

    Returns wt with shape (k_h, w_in_cols*c_in, out_w*c_out) where
      wt[kh, wi*c_in + c, j*c_out + o] = weight[o, c, kh, wi - j*s_w]
    when 0 <= wi - j*s_w < k_w and 0 otherwise.  A matmul of the folded input
    rows (tile_h, w_in_cols*c_in) with wt[kh] produces the conv contribution of
    vertical tap kh for every (output column, output channel) pair at once,
    already in the lane-dense folded output layout.  Width stride is handled
    here, for free, by the band placement.
    """
    c_out, c_in, k_h, k_w = weight_oihw.shape
    w_hwio = jnp.transpose(weight_oihw, (2, 3, 1, 0))          # (kh, kw, ci, co)
    wi = jnp.arange(w_in_cols)
    jj = jnp.arange(out_w)
    kw_idx = wi[:, None] - jj[None, :] * s_w                   # (w_in_cols, out_w)
    valid = (kw_idx >= 0) & (kw_idx < k_w)
    kw_safe = jnp.clip(kw_idx, 0, k_w - 1)
    g = w_hwio[:, kw_safe]                    # (kh, w_in_cols, out_w, ci, co)
    g = g * valid[None, :, :, None, None].astype(g.dtype)
    wt = jnp.transpose(g, (0, 1, 3, 2, 4)).reshape(
        k_h, w_in_cols * c_in, out_w * c_out)
    return wt.astype(dtype)


def _conv_bn_silu_kernel(x_ref, w_ref, scale_ref, shift_ref, o_ref, *,
                         k_h, tile_h, s_h, approx_sigmoid, mxu_precision):
    """Fused conv (+folded BN) (+SiLU) for one (image, output-row-tile) step.

    x_ref:     (1, h_in_p, in_fold)     zero-padded input, W*C_in folded in lanes
    w_ref:     (k_h, in_fold, out_fold) banded weight, one slab per vertical tap
    scale_ref: (1, out_fold)            folded BN scale, tiled over out columns
    shift_ref: (1, out_fold)            folded BN shift
    o_ref:     (1, tile_h, out_fold)    output rows, W*C_out folded in lanes
    """
    r = pl.program_id(1)
    row0 = pl.multiple_of(r * (tile_h * s_h), tile_h * s_h)

    def tap(kh):
        if s_h == 1:
            rows = x_ref[0, pl.ds(row0 + kh, tile_h), :]
        else:
            # TODO(synk): stride_h > 1 path (strided sublane reads) is untested.
            rows = x_ref[0, pl.ds(row0 + kh, tile_h, stride=s_h), :]
        return jnp.dot(rows, w_ref[kh],
                       preferred_element_type=jnp.float32,
                       precision=mxu_precision)

    acc = tap(0)
    for kh in range(1, k_h):
        acc = acc + tap(kh)                      # f32 accumulation across taps

    # Folded BatchNorm (eval mode) + SiLU epilogue in f32, lane-dense store.
    y = acc * scale_ref[...] + shift_ref[...]
    # exp + reciprocal both run on the EUP slot; exact divide on the parity path.
    y = y * pl.reciprocal(1.0 + jnp.exp(-y), approx=approx_sigmoid)
    o_ref[0] = y.astype(o_ref.dtype)


def conv_layer_forward(x_nchw, weight_oihw, gamma, beta, running_mean,
                       running_var, *, stride=(1, 1), eps=1e-5,
                       compute_dtype=jnp.bfloat16):
    """ConvLayer.forward: Conv2d(bias=False, groups=1) -> BN(eval) -> SiLU.

    compute_dtype feeds the MXU and the kernel writeback (bf16 default; pass
    jnp.float32 for near-exact parity).  Accumulation and the BN/SiLU epilogue
    are always f32.
    """
    n, c_in, h, w = x_nchw.shape
    c_out, c_in_w, k_h, k_w = weight_oihw.shape
    assert c_in == c_in_w, "groups=1 only"       # TODO(synk): groups>1/depthwise
    if isinstance(stride, int):
        stride = (stride, stride)
    s_h, s_w = stride
    p_h, p_w = (k_h - 1) // 2, (k_w - 1) // 2
    out_h = (h + 2 * p_h - k_h) // s_h + 1
    out_w = (w + 2 * p_w - k_w) // s_w + 1

    LANE = 128
    w_in_cols = w + 2 * p_w                      # padded input width
    h_in_p = _round_up(h + 2 * p_h, 8)           # sublane-friendly padded height
    in_fold = w_in_cols * c_in                   # folded width*channel lanes
    in_fold_p = _round_up(in_fold, LANE)
    out_fold = out_w * c_out
    out_fold_p = _round_up(out_fold, LANE)

    tile_h = _pick_tile_h(out_h, n, out_fold_p)
    n_row_tiles = out_h // tile_h

    # --- wrapper glue: layout folding + BN folding (not the hot path) --------
    # TODO(synk): the NCHW<->channels-last transposes are small extra HBM passes;
    # they vanish if the surrounding graph stays channels-last / pre-folded.
    x_nhwc = jnp.transpose(x_nchw, (0, 2, 3, 1)).astype(compute_dtype)
    x_pad = jnp.pad(x_nhwc, ((0, 0),
                             (p_h, h_in_p - h - p_h),
                             (p_w, w_in_cols - w - p_w),
                             (0, 0)))
    x_fold = x_pad.reshape(n, h_in_p, in_fold)
    if in_fold_p != in_fold:
        x_fold = jnp.pad(x_fold, ((0, 0), (0, 0), (0, in_fold_p - in_fold)))

    # Banded conv weight (built once, VMEM-resident across the whole grid).
    wt = _build_banded_weight(weight_oihw, out_w, w_in_cols, s_w, compute_dtype)
    wt = jnp.pad(wt, ((0, 0),
                      (0, in_fold_p - in_fold),
                      (0, out_fold_p - out_fold)))

    # Eval-mode BN folded to per-channel scale/shift, tiled along out_w so it
    # broadcasts directly against the folded (out_w*c_out) output layout.
    scale = (gamma / jnp.sqrt(running_var + eps)).astype(jnp.float32)
    shift = (beta - running_mean * scale).astype(jnp.float32)
    scale_f = jnp.pad(jnp.tile(scale, out_w), (0, out_fold_p - out_fold),
                      constant_values=1.0).reshape(1, out_fold_p)
    shift_f = jnp.pad(jnp.tile(shift, out_w),
                      (0, out_fold_p - out_fold)).reshape(1, out_fold_p)

    exact = jnp.dtype(compute_dtype) == jnp.dtype(jnp.float32)
    kernel = functools.partial(
        _conv_bn_silu_kernel,
        k_h=k_h, tile_h=tile_h, s_h=s_h,
        approx_sigmoid=not exact,
        mxu_precision=(jax.lax.Precision.HIGHEST if exact else None))

    # VMEM limit derived from actual buffer sizes (double-buffered inputs +
    # output + f32 accumulator), clamped conservatively for v7x's 64 MiB VMEM.
    itemsize = jnp.dtype(compute_dtype).itemsize
    est = 2 * (h_in_p * in_fold_p * itemsize
               + k_h * in_fold_p * out_fold_p * itemsize
               + tile_h * out_fold_p * itemsize
               + 2 * out_fold_p * 4) + tile_h * out_fold_p * 4
    vmem_limit = int(min(max(2 * est, 32 << 20), 48 << 20))

    out_folded = pl.pallas_call(
        kernel,
        out_shape=jax.ShapeDtypeStruct((n, out_h, out_fold_p), compute_dtype),
        grid_spec=pltpu.PrefetchScalarGridSpec(
            num_scalar_prefetch=0,
            grid=(n, n_row_tiles),
            in_specs=[
                # Whole folded image per batch element; block index is constant
                # along the row-tile axis -> VMEM-resident, DMA'd once per image.
                # (Now ~32x smaller than before since C_in is not padded.)
                # TODO(synk): halo row-tiling of the input for very tall images.
                pl.BlockSpec((1, h_in_p, in_fold_p), lambda b, r: (b, 0, 0)),
                pl.BlockSpec((k_h, in_fold_p, out_fold_p),
                             lambda b, r: (0, 0, 0)),
                pl.BlockSpec((1, out_fold_p), lambda b, r: (0, 0)),
                pl.BlockSpec((1, out_fold_p), lambda b, r: (0, 0)),
            ],
            out_specs=pl.BlockSpec((1, tile_h, out_fold_p),
                                   lambda b, r: (b, r, 0)),
        ),
        compiler_params=pltpu.CompilerParams(
            dimension_semantics=("parallel", "parallel"),
            vmem_limit_bytes=vmem_limit),
    )(x_fold, wt, scale_f, shift_f)

    # Unfold (free reshape of the trailing dim), drop lane padding, back to NCHW.
    out_nhwc = out_folded[:, :, :out_fold].reshape(n, out_h, out_w, c_out)
    return jnp.transpose(out_nhwc, (0, 3, 1, 2)).astype(x_nchw.dtype)


def _reference_forward(x_nchw, weight_oihw, gamma, beta, running_mean,
                       running_var, *, stride=(1, 1), eps=1e-5):
    """Pure-JAX reference (lax conv + eval-mode BN + SiLU), NCHW, f32."""
    k_h, k_w = weight_oihw.shape[2], weight_oihw.shape[3]
    p_h, p_w = (k_h - 1) // 2, (k_w - 1) // 2
    y = jax.lax.conv_general_dilated(
        x_nchw, weight_oihw, window_strides=stride,
        padding=[(p_h, p_h), (p_w, p_w)],
        dimension_numbers=("NCHW", "OIHW", "NCHW"),
        precision=jax.lax.Precision.HIGHEST)
    scale = gamma / jnp.sqrt(running_var + eps)
    shift = beta - running_mean * scale
    y = y * scale[None, :, None, None] + shift[None, :, None, None]
    return y * jax.nn.sigmoid(y)


if __name__ == "__main__":
    # ConvLayer(in_channels=4, out_channels=8, kernel_size=3, stride=1,
    #           groups=1, bias=False, use_norm=True, use_act=True)
    N, C_IN, H, W = 2, 4, 16, 16
    C_OUT, K = 8, 3

    key = jax.random.PRNGKey(0)
    kx, kw_, kg, kb, km, kv = jax.random.split(key, 6)

    x = jax.random.normal(kx, (N, C_IN, H, W), dtype=jnp.float32)
    weight = jax.random.normal(kw_, (C_OUT, C_IN, K, K), dtype=jnp.float32) * 0.1
    gamma = 1.0 + 0.1 * jax.random.normal(kg, (C_OUT,), dtype=jnp.float32)
    beta = 0.1 * jax.random.normal(kb, (C_OUT,), dtype=jnp.float32)
    running_mean = 0.1 * jax.random.normal(km, (C_OUT,), dtype=jnp.float32)
    running_var = 1.0 + 0.1 * jax.random.uniform(kv, (C_OUT,), dtype=jnp.float32)

    ref = _reference_forward(x, weight, gamma, beta, running_mean, running_var,
                             stride=(1, 1))
    ref = jax.block_until_ready(ref)

    # Near-exact-parity path: f32 operands on the MXU, exact sigmoid.
    out_f32 = conv_layer_forward(x, weight, gamma, beta, running_mean,
                                 running_var, stride=(1, 1),
                                 compute_dtype=jnp.float32)
    out_f32 = jax.block_until_ready(out_f32)
    assert out_f32.shape == (N, C_OUT, H, W), out_f32.shape
    assert jnp.allclose(out_f32, ref, rtol=1e-3, atol=1e-3), (
        float(jnp.max(jnp.abs(out_f32 - ref))))

    # Fast path (default): bf16 operands + bf16 writeback, f32 accumulation.
    out_bf16 = conv_layer_forward(x, weight, gamma, beta, running_mean,
                                  running_var, stride=(1, 1))
    out_bf16 = jax.block_until_ready(out_bf16)
    assert out_bf16.shape == (N, C_OUT, H, W), out_bf16.shape
    assert jnp.allclose(out_bf16, ref, rtol=3e-2, atol=3e-2), (
        float(jnp.max(jnp.abs(out_bf16 - ref))))

    print("KERNEL_OK")
</pallas_src>

<mosaic_0001>
module attributes {stable_mosaic.version = 11 : i64} {
  func.func @_conv_bn_silu_kernel(%arg0: i32, %arg1: i32, %arg2: memref<1x24x128xf32, #tpu.memory_space<vmem>>, %arg3: memref<3x128x128xf32, #tpu.memory_space<vmem>>, %arg4: memref<1x128xf32, #tpu.memory_space<vmem>>, %arg5: memref<1x128xf32, #tpu.memory_space<vmem>>, %arg6: memref<1x16x128xf32, #tpu.memory_space<vmem>>) attributes {dimension_semantics = [#tpu.dimension_semantics<parallel>, #tpu.dimension_semantics<parallel>], iteration_bounds = array<i64: 2, 1>, scalar_prefetch = 0 : i64, scratch_operands = 0 : i64, tpu.core_type = #tpu.core_type<tc>, window_params = [{transform_indices = @transform_0, window_bounds = array<i64: 1, 24, 128>}, {pipeline_mode = #tpu.pipeline_mode<synchronous>, transform_indices = @transform_1, window_bounds = array<i64: 3, 128, 128>}, {pipeline_mode = #tpu.pipeline_mode<synchronous>, transform_indices = @transform_2, window_bounds = array<i64: 1, 128>}, {pipeline_mode = #tpu.pipeline_mode<synchronous>, transform_indices = @transform_3, window_bounds = array<i64: 1, 128>}, {transform_indices = @transform_4, window_bounds = array<i64: 1, 16, 128>}]} {
    %c16_i32 = arith.constant 16 : i32
    %0 = arith.muli %arg1, %c16_i32 : i32
    %1 = tpu.assume_multiple %0, 16 : i32
    %c0_i32 = arith.constant 0 : i32
    %2 = arith.addi %1, %c0_i32 : i32
    %c0 = arith.constant 0 : index
    %3 = arith.index_cast %2 : i32 to index
    %c0_0 = arith.constant 0 : index
    %4 = vector.load %arg2[%c0, %3, %c0_0] : memref<1x24x128xf32, #tpu.memory_space<vmem>>, vector<1x16x128xf32>
    %5 = vector.shape_cast %4 : vector<1x16x128xf32> to vector<16x128xf32>
    %c0_1 = arith.constant 0 : index
    %c0_2 = arith.constant 0 : index
    %c0_3 = arith.constant 0 : index
    %6 = vector.load %arg3[%c0_1, %c0_2, %c0_3] : memref<3x128x128xf32, #tpu.memory_space<vmem>>, vector<1x128x128xf32>
    %7 = vector.shape_cast %6 : vector<1x128x128xf32> to vector<128x128xf32>
    %cst = arith.constant dense<0.000000e+00> : vector<16x128xf32>
    %8 = tpu.matmul %5, %7, %cst {dimension_numbers = #tpu.dot_dimension_numbers<[1], [0], [0], [1], [0, 0, 1, 1], [], []>, precision = #tpu.contract_precision<fp32>} : vector<16x128xf32>, vector<128x128xf32>, vector<16x128xf32> -> vector<16x128xf32>
    %c1_i32 = arith.constant 1 : i32
    %9 = arith.addi %1, %c1_i32 : i32
    %c0_4 = arith.constant 0 : index
    %10 = arith.index_cast %9 : i32 to index
    %c0_5 = arith.constant 0 : index
    %11 = vector.load %arg2[%c0_4, %10, %c0_5] : memref<1x24x128xf32, #tpu.memory_space<vmem>>, vector<1x16x128xf32>
    %12 = vector.shape_cast %11 : vector<1x16x128xf32> to vector<16x128xf32>
    %c1 = arith.constant 1 : index
    %c0_6 = arith.constant 0 : index
    %c0_7 = arith.constant 0 : index
    %13 = vector.load %arg3[%c1, %c0_6, %c0_7] : memref<3x128x128xf32, #tpu.memory_space<vmem>>, vector<1x128x128xf32>
    %14 = vector.shape_cast %13 : vector<1x128x128xf32> to vector<128x128xf32>
    %cst_8 = arith.constant dense<0.000000e+00> : vector<16x128xf32>
    %15 = tpu.matmul %12, %14, %cst_8 {dimension_numbers = #tpu.dot_dimension_numbers<[1], [0], [0], [1], [0, 0, 1, 1], [], []>, precision = #tpu.contract_precision<fp32>} : vector<16x128xf32>, vector<128x128xf32>, vector<16x128xf32> -> vector<16x128xf32>
    %16 = arith.addf %8, %15 : vector<16x128xf32>
    %c2_i32 = arith.constant 2 : i32
    %17 = arith.addi %1, %c2_i32 : i32
    %c0_9 = arith.constant 0 : index
    %18 = arith.index_cast %17 : i32 to index
    %c0_10 = arith.constant 0 : index
    %19 = vector.load %arg2[%c0_9, %18, %c0_10] : memref<1x24x128xf32, #tpu.memory_space<vmem>>, vector<1x16x128xf32>
    %20 = vector.shape_cast %19 : vector<1x16x128xf32> to vector<16x128xf32>
    %c2 = arith.constant 2 : index
    %c0_11 = arith.constant 0 : index
    %c0_12 = arith.constant 0 : index
    %21 = vector.load %arg3[%c2, %c0_11, %c0_12] : memref<3x128x128xf32, #tpu.memory_space<vmem>>, vector<1x128x128xf32>
    %22 = vector.shape_cast %21 : vector<1x128x128xf32> to vector<128x128xf32>
    %cst_13 = arith.constant dense<0.000000e+00> : vector<16x128xf32>
    %23 = tpu.matmul %20, %22, %cst_13 {dimension_numbers = #tpu.dot_dimension_numbers<[1], [0], [0], [1], [0, 0, 1, 1], [], []>, precision = #tpu.contract_precision<fp32>} : vector<16x128xf32>, vector<128x128xf32>, vector<16x128xf32> -> vector<16x128xf32>
    %24 = arith.addf %16, %23 : vector<16x128xf32>
    %c0_14 = arith.constant 0 : index
    %c0_15 = arith.constant 0 : index
    %25 = vector.load %arg4[%c0_14, %c0_15] : memref<1x128xf32, #tpu.memory_space<vmem>>, vector<1x128xf32>
    %26 = vector.broadcast %25 : vector<1x128xf32> to vector<16x128xf32>
    %27 = arith.mulf %24, %26 : vector<16x128xf32>
    %c0_16 = arith.constant 0 : index
    %c0_17 = arith.constant 0 : index
    %28 = vector.load %arg5[%c0_16, %c0_17] : memref<1x128xf32, #tpu.memory_space<vmem>>, vector<1x128xf32>
    %29 = vector.broadcast %28 : vector<1x128xf32> to vector<16x128xf32>
    %30 = arith.addf %27, %29 : vector<16x128xf32>
    %cst_18 = arith.constant 0.000000e+00 : f32
    %31 = vector.broadcast %cst_18 : f32 to vector<16x128xf32>
    %32 = arith.subf %31, %30 : vector<16x128xf32>
    %33 = math.exp %32 : vector<16x128xf32>
    %cst_19 = arith.constant 1.000000e+00 : f32
    %34 = vector.broadcast %cst_19 : f32 to vector<16x128xf32>
    %35 = arith.addf %34, %33 : vector<16x128xf32>
    %36 = tpu.reciprocal %35 : vector<16x128xf32> -> vector<16x128xf32>
    %37 = arith.mulf %30, %36 : vector<16x128xf32>
    %c0_20 = arith.constant 0 : index
    %c0_21 = arith.constant 0 : index
    %c0_22 = arith.constant 0 : index
    %38 = vector.load %arg6[%c0_20, %c0_21, %c0_22] : memref<1x16x128xf32, #tpu.memory_space<vmem>>, vector<1x16x128xf32>
    %39 = vector.shape_cast %38 : vector<1x16x128xf32> to vector<16x128xf32>
    %40 = vector.shape_cast %37 : vector<16x128xf32> to vector<1x16x128xf32>
    tpu.vector_store %arg6[%c0_20, %c0_21, %c0_22], %40 {strides = array<i32>} : memref<1x16x128xf32, #tpu.memory_space<vmem>>, vector<1x16x128xf32>,
    return
  }
  func.func @transform_0(%arg0: i32, %arg1: i32) -> (i32, i32, i32) {
    %c0_i32 = arith.constant 0 : i32
    %c0_i32_0 = arith.constant 0 : i32
    %c0_i32_1 = arith.constant 0 : i32
    return %arg0, %c0_i32, %c0_i32_0 : i32, i32, i32
  }
  func.func @transform_1(%arg0: i32, %arg1: i32) -> (i32, i32, i32) {
    %c0_i32 = arith.constant 0 : i32
    %c0_i32_0 = arith.constant 0 : i32
    %c0_i32_1 = arith.constant 0 : i32
    %c0_i32_2 = arith.constant 0 : i32
    return %c0_i32, %c0_i32_0, %c0_i32_1 : i32, i32, i32
  }
  func.func @transform_2(%arg0: i32, %arg1: i32) -> (i32, i32) {
    %c0_i32 = arith.constant 0 : i32
    %c0_i32_0 = arith.constant 0 : i32
    %c0_i32_1 = arith.constant 0 : i32
    return %c0_i32, %c0_i32_0 : i32, i32
  }
  func.func @transform_3(%arg0: i32, %arg1: i32) -> (i32, i32) {
    %c0_i32 = arith.constant 0 : i32
    %c0_i32_0 = arith.constant 0 : i32
    %c0_i32_1 = arith.constant 0 : i32
    return %c0_i32, %c0_i32_0 : i32, i32
  }
  func.func @transform_4(%arg0: i32, %arg1: i32) -> (i32, i32, i32) {
    %c0_i32 = arith.constant 0 : i32
    %c0_i32_0 = arith.constant 0 : i32
    return %arg0, %arg1, %c0_i32 : i32, i32, i32
  }
}

</mosaic_0001>

<bundles_post_ra>
// kernel: tpu_custom_call.1
= control target key start
LH: loop header
LB: loop body
LE: loop exit
PB: predicated region body
PF: predicated region fallthrough
CT: control target
= control target key end

     0   :  { %s2816_s0 = inlined_call_operand.hbm [shape: f32[2,24,128], index: 0, kind: input, shape index: {}]   ;;  %s2817_s1 = inlined_call_operand.hbm [shape: f32[3,128,128], index: 1, kind: input, shape index: {}]   ;;  %s2818_s2 = inlined_call_operand.vmem [shape: f32[1,128], index: 2, kind: input, shape index: {}]   ;;  %s2819_s3 = inlined_call_operand.vmem [shape: f32[1,128], index: 3, kind: input, shape index: {}]   ;;  %s2820_s4 = inlined_call_operand.hbm [shape: f32[2,16,128], index: 4, kind: output, shape index: {}]  }
   0x1   :  { %2847 = sst [smem:[#allocation13_spill]] %s2817_s1 }
   0x2   :  { %9 = vsyncpa [#allocation3], 0 }
   0x3   :  { %11 = vsyncpa [#allocation3 + $0x1], 0 }
   0x4   :  { %12 = vsyncpa [#allocation6], 0 }
   0x5   :  { %13 = vsyncpa [#allocation4], 0 }
   0x6   :  { %15 = vsyncpa [#allocation4 + $0x1], 0  ;;  %s1921_s15 = smov 0   ;;  %s1923_s16 = smov 0  }
   0x7   :  { %s1925_s17 = smov 0   ;;  %s1927_s18 = smov 0  }
   0x8   :  { %s1929_s19 = smov 0   ;;  %s1931_s20 = smov 0  }
   0x9 LB: > { %s1602_s21 = sadd.s32 4294967295, %s1889_s20   ;;  %s1603_s22 = sadd.s32 4294967294, %s1889_s20   ;;  %s1889_s20 = sphi %s1931_s20, %s21_s20   ;;  %s1885_s19 = sphi %s1929_s19, %s2892_s19   ;;  %s1881_s18 = sphi %s1927_s18, %s2891_s18   ;;  %s1877_s17 = sphi %s1925_s17, %s2890_s17   ;;  %s1873_s16 = sphi %s1923_s16, %s2889_s16   ;;  %s1869_s15 = sphi %s1921_s15, %s2888_s15  }
   0xa   : > { %p53_p0 = scmp.ne.s32.totalorder %s1873_s16, %s1869_s15  ;;  %p1955_p1 = scmp.eq.s32.totalorder %s1602_s21, 0 }
   0xb   : > { %p1959_p2 = scmp.eq.s32.totalorder %s1602_s21, 1  ;;  %p148_p3 = scmp.eq.s32.totalorder %s1603_s22, 1 }
   0xc   : > { %p1965_p4 = por %p1955_p1, %p53_p0  ;;  %p1604_p5 = scmp.ge.s32.totalorder %s1889_s20, 1 }
   0xd   : > { %p1970_p6 = por %p148_p3, %p53_p0  ;;  %p155_p7 = scmp.lt.s32.totalorder %s1889_s20, 3 }
   0xe   : > { %s2852_s1 = sld [smem:[#allocation13_spill]]  ;;  %s1891_s5 = smov [#allocation5]  }
   0xf   : > { %p1978_p8 = pnand %p1604_p5, %p155_p7  ;;  %s168_s6 = sshll.u32 %s1891_s5, 4  ;;  %s169_s6 = int_to_ptr.vmem [resolvable:$true] %s168_s6 }
  0x10   : > { %p1606_p11 = scmp.ge.s32.totalorder %s1889_s20, 2  ;;  %s2821_s7 = smov 128  }
  0x11   : > { %p1664_p9 = pneg %p1978_p8  ;;  %s1893_s8 = smov 8  }
  0x12   : > { %s33_s9 = sadd.s32 1, %s1885_s19  ;;  %s40_s10 = sadd.s32 1, %s1877_s17 }
  0x13   : > { %p1665_p10 = pnand %p1664_p9, %p1955_p1  ;;  %p35_p12 = scmp.ge.s32.totalorder %s33_s9, 2 }
  0x14   : > { %s166_s29 = sshll.u32 %s2852_s1, 4  ;;  %p47_p13 = scmp.ne.s32.totalorder %s1877_s17, %s1873_s16  ;;  %s167_s29 = int_to_ptr.hbm [resolvable:$true] %s166_s29 }
  0x15   : > { %1667 = dma.hbm_to_vmem [thread:$0]  (!%p1665_p10), %s167_s29, 6144, %s169_s6, [#allocation6], %s2821_s7, %s2821_s7, %s1893_s8  }
  0x16   : > { %p48_p0 = scmp.eq.s32.totalorder %s1889_s20, 0  ;;  %s2894_s9 = smov (%p35_p12, %s33_s9), 0 }
  0x17   : > { %p1999_p5 = por %p1959_p2, %p47_p13  ;;  %s37_s12 = ssub.s32 %s1885_s19, %s2894_s9 }
  0x18   : > { %p49_p3 = por %p48_p0, %p47_p13  ;;  %p1677_p7 = scmp.lt.s32.totalorder %s1889_s20, 2 }
  0x19   : > { %p38_p9 = scmp.eq.s32.totalorder %s37_s12, 0  ;;  %s188_s13 = sand.u32 1, %s1877_s17  }
  0x1a   : > { %s1653_s14 = smul.u32 24, %s188_s13  ;;  %p1669_p10 = pnand %p1677_p7, %p49_p3 }
  0x1b   : > { %s2008_s21 = scalar_select %p38_p9, %s1877_s17, %s40_s10  }
  0x1c   : > { %s1654_s22 = smul.u32 24, %s1885_s19  ;;  %s192_s27 = scalar_lea.vmem [#allocation2], %s1653_s14 }
  0x1d   : > { %s200_s28 = sshll.u32 %s192_s27, 4  ;;  %s189_s7 = scalar_lea.sflag [#allocation3], %s188_s13  ;;  %s201_s28 = int_to_ptr.vmem [resolvable:$true] %s200_s28 }
  0x1e   : > { %s197_s6 = scalar_lea.hbm %s2816_s0, %s1654_s22  ;;  %s2855_s1 = smov 128  }
  0x1f   : > { %s198_s24 = sshll.u32 %s197_s6, 4  ;;  %212 = sbr.rel (%p1978_p8) target bundleno = 401 (0x191), region = 36  ;;  %s199_s24 = int_to_ptr.hbm [resolvable:$true] %s198_s24 }
  0x20   : > { %1671 = dma.hbm_to_vmem [thread:$0]  (!%p1669_p10), %s199_s24, 384, %s201_s28, %s189_s7, %s2855_s1, %s2855_s1, %s1893_s8  }
  0x24   : > { %s2020_s10 = sand.u32 1, %s1873_s16  }
  0x25   : > { %s1655_s12 = smul.u32 24, %s2020_s10  ;;  %s215_s14 = scalar_lea.sflag [#allocation3], %s2020_s10 }
  0x27   : > { %s2024_s22 = scalar_lea.vmem [#allocation2], %s1655_s12 }
  0x28   : > { %1856 = dma.done.wait (%p1965_p4), %s215_s14, 384  }
  0x29   : > { %1858 = vsyncadd (%p1965_p4), %s215_s14, 4294966912 }
  0x2a   : > { %1860 = dma.done.wait (%p1955_p1), [#allocation6], 6144  }
  0x2b   : > { %1862 = vsyncadd (%p1955_p1), [#allocation6], 4294961152  ;;  %v290_v0 = vld [vmem:[#allocation5 + $0xf8] sm:$0xff]  ;;  %v289_v1 = vld [vmem:[#allocation5 + $0xf0] sm:$0xff]  ;;  %s1610_s7 = sshll.u32 %s2020_s10, 4  ;;  %s1620_s8 = sshll.u32 %s1881_s18, 4 }
  0x2c   : > { %v288_v2 = vld [vmem:[#allocation5 + $0xe8] sm:$0xff]  ;;  %v2034_v3 = vand.u32 4294901760, %v290_v0  ;;  %v2036_v4 = vand.u32 4294901760, %v289_v1  ;;  %v287_v6 = vld [vmem:[#allocation5 + $0xe0] sm:$0xff]  ;;  %v286_v7 = vld [vmem:[#allocation5 + $0xd8] sm:$0xff]  ;;  %s1496_s28 = scalar_lea.hbm %s2820_s4, %s1620_s8  ;;  %s248_s18 = scalar_lea.vmem [#allocation7], %s1610_s7 }
  0x2d   : > { %v2038_v5 = vand.u32 4294901760, %v288_v2  ;;  %v285_v8 = vld [vmem:[#allocation5 + $0xd0] sm:$0xff]  ;;  %v2040_v9 = vand.u32 4294901760, %v287_v6  ;;  %v2042_v10 = vand.u32 4294901760, %v286_v7  ;;  %v284_v12 = vld [vmem:[#allocation5 + $0xc8] sm:$0xff]  ;;  %v283_v13 = vld [vmem:[#allocation5 + $0xc0] sm:$0xff] }
  0x2e   : > { %v2044_v11 = vand.u32 4294901760, %v285_v8  ;;  %292 = vmatpush.msra.mxu0 %v2034_v3  ;;  %v2048_v14 = vsub.f32 %v290_v0, %v2034_v3  ;;  %v2051_v15 = vsub.f32 %v289_v1, %v2036_v4  ;;  %505 = vmatpush.msra.mxu3 %v2034_v3  ;;  %v2057_v17 = vand.u32 4294901760, %v284_v12  ;;  %v282_v18 = vld [vmem:[#allocation5 + $0xb8] sm:$0xff]  ;;  %v281_v29 = vld [vmem:[#allocation5 + $0xb0] sm:$0xff]  ;;  %v280_v36 = vld [vmem:[#allocation5 + $0xa8] sm:$0xff]  ;;  %s1497_s29 = sshll.u32 %s248_s18, 4  ;;  %s1498_s29 = int_to_ptr.vmem [resolvable:$true] %s1497_s29 }
  0x2f   : > { %v2055_v16 = vsub.f32 %v288_v2, %v2038_v5  ;;  %v2060_v19 = vsub.f32 %v287_v6, %v2040_v9  ;;  %v2063_v20 = vsub.f32 %v286_v7, %v2042_v10  ;;  %v2068_v22 = vand.u32 4294901760, %v283_v13  ;;  %v279_v42 = vld [vmem:[#allocation5 + $0xa0] sm:$0xff]  ;;  %v278_v48 = vld [vmem:[#allocation5 + $0x98] sm:$0xff]  ;;  %v277_v54 = vld [vmem:[#allocation5 + $0x90] sm:$0xff]  ;;  %s1499_s5 = sshll.u32 %s1496_s28, 4  ;;  %s1483_s6 = scalar_lea.sflag [#allocation4], %s2020_s10  ;;  %s1500_s5 = int_to_ptr.hbm [resolvable:$true] %s1499_s5 }
  0x30   : > { %v2066_v21 = vsub.f32 %v285_v8, %v2044_v11  ;;  %294 = vmatpush.msra.mxu0 %v2036_v4  ;;  %447 = vmatpush.msra.mxu2 %v2048_v14  ;;  %v342_v23 = vand.u32 4294901760, %v2048_v14  ;;  %v2838_v24 = vand.u32 4294901760, %v2051_v15  ;;  %v2078_v27 = vsub.f32 %v284_v12, %v2057_v17  ;;  %v269_v59 = vld [vmem:[#allocation5 + $0x78] sm:$0xff]  ;;  %v276_v61 = vld [vmem:[#allocation5 + $0x88] sm:$0xff]  ;;  %v275_v2 = vld [vmem:[#allocation5 + $0x80] sm:$0xff]  ;;  %s1817_s24 = sshra.s32 %s1500_s5, 4  ;;  %s1818_s24 = int_to_ptr.hbm [resolvable:$true] %s1817_s24 }
  0x31   : > { %v2835_v25 = vand.u32 4294901760, %v2055_v16  ;;  %507 = vmatpush.msra.mxu3 %v2036_v4  ;;  %v2834_v26 = vand.u32 4294901760, %v2060_v19  ;;  %v2080_v28 = vand.u32 4294901760, %v282_v18  ;;  %v2831_v33 = vand.u32 4294901760, %v2063_v20  ;;  %v268_v6 = vld [vmem:[#allocation5 + $0x70] sm:$0xff]  ;;  %s1819_s12 = scalar_lea.hbm %s1818_s24, 16  ;;  %p1824_p8 = scmp.lt.s32.totalorder %s1818_s24, %s2820_s4 }
  0x32   : > { %296 = vmatpush.msra.mxu0 %v2038_v5  ;;  %450 = vmatpush.msra.mxu2 %v2051_v15  ;;  %v343_v30 = vsub.f32 %v2048_v14, %v342_v23  ;;  %v349_v31 = vsub.f32 %v2051_v15, %v2838_v24  ;;  %v2096_v34 = vsub.f32 %v283_v13, %v2068_v22  ;;  %v2830_v35 = vand.u32 4294901760, %v2066_v21  ;;  %v260_v24 = vld [vmem:[#allocation5 + $0x30] sm:$0xff]  ;;  %p1820_p1 = scmp.ne.s32.totalorder %s1818_s24, %s1819_s12  ;;  %s1823_s1 = scalar_lea.hbm %s2820_s4, 32 }
  0x33   : > { %v355_v32 = vsub.f32 %v2055_v16, %v2835_v25  ;;  %509 = vmatpush.msra.mxu3 %v2038_v5  ;;  %v361_v39 = vsub.f32 %v2060_v19, %v2834_v26  ;;  %v2104_v40 = vand.u32 4294901760, %v281_v29  ;;  %v2828_v41 = vand.u32 4294901760, %v2078_v27  ;;  %p1825_p12 = scmp.lt.s32.totalorder %s1823_s1, %s1819_s12 }
  0x34   : > { %298 = vmatpush.msra.mxu0 %v2040_v9  ;;  %453 = vmatpush.msra.mxu2 %v2055_v16  ;;  %v344_v37 = vand.u32 4294901760, %v343_v30  ;;  %v350_v38 = vand.u32 4294901760, %v349_v31  ;;  %v367_v44 = vsub.f32 %v2063_v20, %v2831_v33  ;;  %v2113_v45 = vsub.f32 %v282_v18, %v2080_v28  ;;  %v267_v30 = vld [vmem:[#allocation5 + $0x68] sm:$0xff]  ;;  %p1821_p2 = pnand %p1820_p1, %p1999_p5 }
  0x35   : > { %511 = vmatpush.msra.mxu3 %v2040_v9  ;;  %v356_v43 = vand.u32 4294901760, %v355_v32  ;;  %v2115_v46 = vand.u32 4294901760, %v280_v36  ;;  %v373_v47 = vsub.f32 %v2066_v21, %v2830_v35  ;;  %v362_v49 = vand.u32 4294901760, %v361_v39  ;;  %p1826_p13 = por %p1825_p12, %p1824_p8 }
  0x36   : > { %300 = vmatpush.msra.mxu0 %v2042_v10  ;;  %345 = vmatpush.msra.mxu1 %v344_v37  ;;  %v2124_v50 = vsub.f32 %v281_v29, %v2104_v40  ;;  %v2126_v51 = vand.u32 4294901760, %v279_v42  ;;  %v2827_v52 = vand.u32 4294901760, %v2096_v34  ;;  %v379_v53 = vsub.f32 %v2078_v27, %v2828_v41  ;;  %p1822_p4 = pneg %p1821_p2 }
  0x37   : > { %456 = vmatpush.msra.mxu2 %v2060_v19  ;;  %513 = vmatpush.msra.mxu3 %v2042_v10  ;;  %v368_v55 = vand.u32 4294901760, %v367_v44  ;;  %v2136_v56 = vsub.f32 %v280_v36, %v2115_v46  ;;  %v2138_v57 = vand.u32 4294901760, %v278_v48  ;;  %v2825_v58 = vand.u32 4294901760, %v2113_v45  ;;  %v266_v44 = vld [vmem:[#allocation5 + $0x60] sm:$0xff] }
  0x38   : > { %302 = vmatpush.msra.mxu0 %v2044_v11  ;;  %351 = vmatpush.msra.mxu1 %v350_v38  ;;  %v374_v60 = vand.u32 4294901760, %v373_v47  ;;  %v385_v62 = vsub.f32 %v2096_v34, %v2827_v52  ;;  %v2148_v63 = vsub.f32 %v279_v42, %v2126_v51  ;;  %v2150_v0 = vand.u32 4294901760, %v277_v54  ;;  %p1827_p0 = pnand %p1826_p13, %p1822_p4 }
  0x39   : > { %459 = vmatpush.msra.mxu2 %v2063_v20  ;;  %515 = vmatpush.msra.mxu3 %v2044_v11  ;;  %v2824_v1 = vand.u32 4294901760, %v2124_v50  ;;  %v380_v7 = vand.u32 4294901760, %v379_v53  ;;  %v2155_v8 = vand.u32 4294901760, %v269_v59  ;;  %v391_v12 = vsub.f32 %v2113_v45, %v2825_v58  ;;  %v263_v58 = vld [vmem:[#allocation5 + $0x48] sm:$0xff] }
  0x3a   : > { %304 = vmatpush.msra.mxu0 %v2057_v17  ;;  %357 = vmatpush.msra.mxu1 %v356_v43  ;;  %v2162_v13 = vsub.f32 %v278_v48, %v2138_v57  ;;  %v2164_v18 = vand.u32 4294901760, %v276_v61  ;;  %v2823_v29 = vand.u32 4294901760, %v2136_v56  ;;  %v2169_v31 = vand.u32 4294901760, %v275_v2 }
  0x3b   : > { %462 = vmatpush.msra.mxu2 %v2066_v21  ;;  %517 = vmatpush.msra.mxu3 %v2057_v17  ;;  %v2171_v32 = vand.u32 4294901760, %v268_v6  ;;  %v386_v36 = vand.u32 4294901760, %v385_v62  ;;  %v397_v37 = vsub.f32 %v2124_v50, %v2824_v1  ;;  %v2178_v38 = vsub.f32 %v277_v54, %v2150_v0 }
  0x3c   : > { %306 = vmatpush.msra.mxu0 %v2068_v22  ;;  %363 = vmatpush.msra.mxu1 %v362_v49  ;;  %2856 = vst [vmem:[#allocation11_spill] sm:$0xff] %v2169_v31  ;;  %v2822_v39 = vand.u32 4294901760, %v2148_v63  ;;  %v2184_v42 = vsub.f32 %v269_v59, %v2155_v8  ;;  %v2186_v43 = vand.u32 4294901760, %v267_v30  ;;  %v392_v47 = vand.u32 4294901760, %v391_v12  ;;  %v265_v59 = vld [vmem:[#allocation5 + $0x58] sm:$0xff]  ;;  %v264_v12 = vld [vmem:[#allocation5 + $0x50] sm:$0xff] }
  0x3d   : > { %465 = vmatpush.msra.mxu2 %v2078_v27  ;;  %519 = vmatpush.msra.mxu3 %v2068_v22  ;;  %v403_v48 = vsub.f32 %v2136_v56, %v2823_v29  ;;  %v2193_v49 = vsub.f32 %v276_v61, %v2164_v18  ;;  %v2826_v53 = vand.u32 4294901760, %v2162_v13  ;;  %v2199_v54 = vsub.f32 %v275_v2, %v2169_v31 }
  0x3e   : > { %308 = vmatpush.msra.mxu0 %v2080_v28  ;;  %369 = vmatpush.msra.mxu1 %v368_v55  ;;  %v2202_v55 = vsub.f32 %v268_v6, %v2171_v32  ;;  %v409_v61 = vsub.f32 %v2148_v63, %v2822_v39  ;;  %v2829_v62 = vand.u32 4294901760, %v2178_v38  ;;  %v2832_v2 = vand.u32 4294901760, %v2184_v42 }
  0x3f   : > { %468 = vmatpush.msra.mxu2 %v2096_v34  ;;  %521 = vmatpush.msra.mxu3 %v2080_v28  ;;  %v2215_v6 = vsub.f32 %v267_v30, %v2186_v43  ;;  %v2833_v39 = vand.u32 4294901760, %v2193_v49  ;;  %v2222_v29 = vand.u32 4294901760, %v265_v59  ;;  %v2837_v1 = vand.u32 4294901760, %v2199_v54 }
  0x40   : > { %310 = vmatpush.msra.mxu0 %v2104_v40  ;;  %375 = vmatpush.msra.mxu1 %v374_v60  ;;  %v398_v60 = vand.u32 4294901760, %v397_v37  ;;  %v415_v37 = vsub.f32 %v2162_v13, %v2826_v53  ;;  %v2836_v30 = vand.u32 4294901760, %v2202_v55  ;;  %v2235_v52 = vand.u32 4294901760, %v264_v12 }
  0x41   : > { %471 = vmatpush.msra.mxu2 %v2113_v45  ;;  %523 = vmatpush.msra.mxu3 %v2104_v40  ;;  %v715_v41 = vsub.f32 %v2184_v42, %v2832_v2  ;;  %v2248_v35 = vsub.f32 %v265_v59, %v2222_v29  ;;  %v2250_v33 = vand.u32 4294901760, %v263_v58  ;;  %v2858_v14 = vand.u32 4294901760, %v2051_v15 }
  0x42   : > { %312 = vmatpush.msra.mxu0 %v2115_v46  ;;  %381 = vmatpush.msra.mxu1 %v380_v7  ;;  %v2209_v7 = vand.u32 4294901760, %v266_v44  ;;  %v721_v2 = vsub.f32 %v2202_v55, %v2836_v30  ;;  %v2263_v26 = vsub.f32 %v264_v12, %v2235_v52  ;;  %v2860_v15 = vand.u32 4294901760, %v2055_v16 }
  0x43   : > { %474 = vmatpush.msra.mxu2 %v2124_v50  ;;  %525 = vmatpush.msra.mxu3 %v2115_v46  ;;  %v716_v30 = vand.u32 4294901760, %v715_v41  ;;  %v2862_v16 = vand.u32 4294901760, %v2060_v19 }
  0x44   : > { %314 = vmatpush.msra.mxu0 %v2126_v51  ;;  %387 = vmatpush.msra.mxu1 %v386_v36  ;;  %v404_v36 = vand.u32 4294901760, %v403_v48  ;;  %v421_v48 = vsub.f32 %v2178_v38, %v2829_v62  ;;  %v2233_v53 = vsub.f32 %v266_v44, %v2209_v7  ;;  %v416_v62 = vand.u32 4294901760, %v415_v37  ;;  %v261_v37 = vld [vmem:[#allocation5 + $0x38] sm:$0xff] }
  0x45   : > { %477 = vmatpush.msra.mxu2 %v2136_v56  ;;  %527 = vmatpush.msra.mxu3 %v2126_v51  ;;  %v427_v44 = vsub.f32 %v2193_v49, %v2833_v39  ;;  %v2278_v39 = vand.u32 4294901760, %v261_v37 }
  0x46   : > { %316 = vmatpush.msra.mxu0 %v2138_v57  ;;  %393 = vmatpush.msra.mxu1 %v392_v47  ;;  %v410_v47 = vand.u32 4294901760, %v409_v61  ;;  %2857 = vst [vmem:[#allocation12_spill] sm:$0xff] %v2233_v53  ;;  %v262_v61 = vld [vmem:[#allocation5 + $0x40] sm:$0xff]  ;;  %v422_v59 = vand.u32 4294901760, %v421_v48  ;;  %v2276_v48 = vsub.f32 %v263_v58, %v2250_v33 }
  0x47   : > { %480 = vmatpush.msra.mxu2 %v2148_v63  ;;  %529 = vmatpush.msra.mxu3 %v2138_v57  ;;  %v2265_v25 = vand.u32 4294901760, %v262_v61  ;;  %v258_v58 = vld [vmem:[#allocation5 + $0x20] sm:$0xff] }
  0x48   : > { %318 = vmatpush.msra.mxu0 %v2150_v0  ;;  %399 = vmatpush.msra.mxu1 %v398_v60  ;;  %v2839_v60 = vand.u32 4294901760, %v2215_v6  ;;  %v2319_v19 = vand.u32 4294901760, %v258_v58 }
  0x49   : > { %483 = vmatpush.msra.mxu2 %v2162_v13  ;;  %531 = vmatpush.msra.mxu3 %v2150_v0  ;;  %v2289_v12 = vsub.f32 %v262_v61, %v2265_v25 }
  0x4a   : > { %320 = vmatpush.msra.mxu0 %v2164_v18  ;;  %405 = vmatpush.msra.mxu1 %v404_v36  ;;  %v433_v36 = vsub.f32 %v2199_v54, %v2837_v1  ;;  %v727_v1 = vsub.f32 %v2215_v6, %v2839_v60  ;;  %v259_v60 = vld [vmem:[#allocation5 + $0x28] sm:$0xff] }
  0x4b   : > { %486 = vmatpush.msra.mxu2 %v2178_v38  ;;  %533 = vmatpush.msra.mxu3 %v2164_v18  ;;  %v2303_v61 = vand.u32 4294901760, %v259_v60 }
  0x4c   : > { %322 = vmatpush.msra.mxu0 %v2169_v31  ;;  %411 = vmatpush.msra.mxu1 %v410_v47  ;;  %v428_v47 = vand.u32 4294901760, %v427_v44  ;;  %v434_v41 = vand.u32 4294901760, %v433_v36  ;;  %v2861_v36 = vand.u32 4294901760, %v2248_v35 }
  0x4d   : > { %489 = vmatpush.msra.mxu2 %v2193_v49  ;;  %535 = vmatpush.msra.mxu3 %v2169_v31  ;;  %v2291_v31 = vand.u32 4294901760, %v260_v24 }
  0x4e   : > { %552 = vmatpush.msrb.mxu0 %v342_v23  ;;  %417 = vmatpush.msra.mxu1 %v416_v62  ;;  %v722_v23 = vand.u32 4294901760, %v721_v2  ;;  %v2859_v62 = vand.u32 4294901760, %v2233_v53  ;;  %v728_v2 = vand.u32 4294901760, %v727_v1 }
  0x4f   : > { %492 = vmatpush.msra.mxu2 %v2199_v54  ;;  %717 = vmatpush.msrb.mxu3 %v716_v30  ;;  %v2863_v30 = vand.u32 4294901760, %v2263_v26 }
  0x50   : > { %556 = vmatpush.msrb.mxu0 %v2858_v14  ;;  %423 = vmatpush.msra.mxu1 %v422_v59  ;;  %v733_v44 = vsub.f32 %v2233_v53, %v2859_v62  ;;  %v739_v59 = vsub.f32 %v2248_v35, %v2861_v36  ;;  %v2843_v14 = vand.u32 4294901760, %v2276_v48  ;;  %v2301_v62 = vsub.f32 %v261_v37, %v2278_v39  ;;  %v1611_v53 = vld [vmem:[%s2024_s22 + $0x1] sm:$0xff] }
  0x51   : > { %664 = vmatpush.msrb.mxu2 %v2155_v8  ;;  %723 = vmatpush.msrb.mxu3 %v722_v23  ;;  %v2314_v37 = vsub.f32 %v260_v24, %v2291_v31  ;;  %v2864_v36 = vand.u32 4294901760, %v2063_v20  ;;  %v2321_v23 = vand.u32 4294901760, %v1611_v53  ;;  %v2329_v20 = vsub.f32 %v259_v60, %v2303_v61 }
  0x52   : > { %560 = vmatpush.msrb.mxu0 %v2860_v15  ;;  %429 = vmatpush.msra.mxu1 %v428_v47  ;;  %v734_v1 = vand.u32 4294901760, %v733_v44  ;;  %v745_v47 = vsub.f32 %v2263_v26, %v2863_v30  ;;  %v2845_v15 = vand.u32 4294901760, %v2289_v12  ;;  %v740_v44 = vand.u32 4294901760, %v739_v59  ;;  %v256_v30 = vld [vmem:[#allocation5 + $0x10] sm:$0xff] }
  0x53   : > { %666 = vmatpush.msrb.mxu2 %v2171_v32  ;;  %729 = vmatpush.msrb.mxu3 %v728_v2  ;;  %v2844_v24 = vand.u32 4294901760, %v2301_v62  ;;  %v2866_v60 = vand.u32 4294901760, %v2078_v27  ;;  %v2846_v27 = vand.u32 4294901760, %v2329_v20 }
  0x54   : > { %564 = vmatpush.msrb.mxu0 %v2862_v16  ;;  %435 = vmatpush.msra.mxu1 %v434_v41  ;;  %v257_v41 = vld [vmem:[#allocation5 + $0x18] sm:$0xff]  ;;  %v751_v16 = vsub.f32 %v2276_v48, %v2843_v14  ;;  %v746_v2 = vand.u32 4294901760, %v745_v47  ;;  %v757_v59 = vsub.f32 %v2289_v12, %v2845_v15 }
  0x55   : > { %668 = vmatpush.msrb.mxu2 %v2186_v43  ;;  %735 = vmatpush.msrb.mxu3 %v734_v1  ;;  %v2339_v14 = vand.u32 4294901760, %v257_v41  ;;  %v255_v1 = vld [vmem:[#allocation5 + $0x8] sm:$0xff]  ;;  %v1612_v15 = vld [vmem:[%s2024_s22 + $0x9] sm:$0xff] }
  0x56   : > { %568 = vmatpush.msrb.mxu0 %v2864_v36  ;;  %623 = vmatpush.msrb.mxu1 %v2034_v3  ;;  %v2865_v3 = vand.u32 4294901760, %v2066_v21  ;;  %v768_v36 = vand.u32 4294901760, %v2314_v37  ;;  %v2348_v21 = vsub.f32 %v258_v58, %v2319_v19  ;;  %v752_v47 = vand.u32 4294901760, %v751_v16 }
  0x57   : > { %670 = vmatpush.msrb.mxu2 %v2209_v7  ;;  %741 = vmatpush.msrb.mxu3 %v740_v44  ;;  %v2365_v44 = vsub.f32 %v257_v41, %v2339_v14  ;;  %v2367_v16 = vand.u32 4294901760, %v255_v1  ;;  %v775_v41 = vsub.f32 %v2329_v20, %v2846_v27 }
  0x58   : > { %572 = vmatpush.msrb.mxu0 %v2865_v3  ;;  %625 = vmatpush.msrb.mxu1 %v2036_v4  ;;  %v2345_v4 = vsub.f32 %v1611_v53, %v2321_v23  ;;  %v763_v3 = vsub.f32 %v2301_v62, %v2844_v24  ;;  %v758_v53 = vand.u32 4294901760, %v757_v59  ;;  %v769_v58 = vsub.f32 %v2314_v37, %v768_v36  ;;  %v254_v24 = vld [vmem:[#allocation5] sm:$0xff] }
  0x59   : > { %672 = vmatpush.msrb.mxu2 %v2222_v29  ;;  %747 = vmatpush.msrb.mxu3 %v746_v2  ;;  %v2392_v27 = vsub.f32 %v255_v1, %v2367_v16  ;;  %v2871_v1 = vand.u32 4294901760, %v2148_v63  ;;  %v2872_v63 = vand.u32 4294901760, %v2162_v13 }
  0x5a   : > { %576 = vmatpush.msrb.mxu0 %v2866_v60  ;;  %627 = vmatpush.msrb.mxu1 %v2038_v5  ;;  %v2355_v60 = vand.u32 4294901760, %v256_v30  ;;  %v2867_v5 = vand.u32 4294901760, %v2096_v34  ;;  %v2868_v34 = vand.u32 4294901760, %v2113_v45  ;;  %v325_v2 = vand.u32 4294901760, %v2345_v4 }
  0x5b   : > { %674 = vmatpush.msrb.mxu2 %v2235_v52  ;;  %753 = vmatpush.msrb.mxu3 %v752_v47  ;;  %v764_v59 = vand.u32 4294901760, %v763_v3  ;;  %v2869_v45 = vand.u32 4294901760, %v2124_v50  ;;  %v770_v47 = vand.u32 4294901760, %v769_v58  ;;  %v786_v3 = vand.u32 4294901760, %v2365_v44 }
  0x5c   : > { %580 = vmatpush.msrb.mxu0 %v2867_v5  ;;  %629 = vmatpush.msrb.mxu1 %v2040_v9  ;;  %v780_v9 = vand.u32 4294901760, %v2348_v21  ;;  %v2380_v5 = vsub.f32 %v256_v30, %v2355_v60  ;;  %v2870_v30 = vand.u32 4294901760, %v2136_v56  ;;  %v326_v50 = vsub.f32 %v2345_v4, %v325_v2 }
  0x5d   : > { %676 = vmatpush.msrb.mxu2 %v2250_v33  ;;  %759 = vmatpush.msrb.mxu3 %v758_v53  ;;  %v776_v53 = vand.u32 4294901760, %v775_v41  ;;  %v798_v41 = vand.u32 4294901760, %v2392_v27 }
  0x5e   : > { %584 = vmatpush.msrb.mxu0 %v2868_v34  ;;  %631 = vmatpush.msrb.mxu1 %v2042_v10  ;;  %v2385_v10 = vand.u32 4294901760, %v254_v24  ;;  %v2387_v34 = vand.u32 4294901760, %v1612_v15  ;;  %v792_v58 = vand.u32 4294901760, %v2380_v5 }
  0x5f   : > { %678 = vmatpush.msrb.mxu2 %v2265_v25  ;;  %765 = vmatpush.msrb.mxu3 %v764_v59  ;;  %v787_v59 = vsub.f32 %v2365_v44, %v786_v3 }
  0x60   : > { %588 = vmatpush.msrb.mxu0 %v2869_v45  ;;  %633 = vmatpush.msrb.mxu1 %v2044_v11  ;;  %v781_v11 = vsub.f32 %v2348_v21, %v780_v9  ;;  %v332_v56 = vsub.f32 %v1612_v15, %v2387_v34  ;;  %v252_v45 = vld [vmem:[%s2024_s22] sm:$0xff]  ;;  %v327_v15 = vand.u32 4294901760, %v326_v50 }
  0x61   : > { %680 = vmatpush.msrb.mxu2 %v2278_v39  ;;  %771 = vmatpush.msrb.mxu3 %v770_v47  ;;  %v2873_v47 = vand.u32 4294901760, %v2178_v38  ;;  %v2874_v38 = vand.u32 4294901760, %v2193_v49  ;;  %v2875_v49 = vand.u32 4294901760, %v2199_v54  ;;  %v2876_v54 = vand.u32 4294901760, %v2184_v42 }
  0x62   : > { %592 = vmatpush.msrb.mxu0 %v2870_v30  ;;  %635 = vmatpush.msrb.mxu1 %v2057_v17  ;;  %v2408_v17 = vsub.f32 %v254_v24, %v2385_v10  ;;  %v793_v24 = vsub.f32 %v2380_v5, %v792_v58  ;;  %v333_v13 = vand.u32 4294901760, %v332_v56 }
  0x63   : > { %682 = vmatpush.msrb.mxu2 %v2291_v31  ;;  %777 = vmatpush.msrb.mxu3 %v776_v53 }
  0x64   : > { %596 = vmatpush.msrb.mxu0 %v2871_v1  ;;  %637 = vmatpush.msrb.mxu1 %v2068_v22  ;;  %v782_v22 = vand.u32 4294901760, %v781_v11  ;;  %v804_v30 = vand.u32 4294901760, %v2408_v17  ;;  %v2427_v1 = vand.u32 4294901760, %v252_v45  ;;  %v799_v11 = vsub.f32 %v2392_v27, %v798_v41 }
  0x65   : > { %684 = vmatpush.msrb.mxu2 %v2303_v61  ;;  %328 = vmatmul.f32.vlgmr.msra.gmra.mxu0 %v327_v15  ;;  %v334_v50 = vsub.f32 %v332_v56, %v333_v13 }
  0x66   : > { %600 = vmatpush.msrb.mxu0 %v2872_v63  ;;  %639 = vmatpush.msrb.mxu1 %v2080_v28  ;;  %v788_v28 = vand.u32 4294901760, %v787_v59  ;;  %v2442_v53 = vsub.f32 %v252_v45, %v2427_v1  ;;  %v2880_v63 = vld [vmem:[#allocation11_spill] sm:$0xff] }
  0x67   : > { %686 = vmatpush.msrb.mxu2 %v2319_v19  ;;  %783 = vmatpush.msrb.mxu3 %v782_v22  ;;  %v335_v59 = vand.u32 4294901760, %v334_v50  ;;  %v253_v22 = vld [vmem:[%s2024_s22 + $0x8] sm:$0xff] }
  0x68   : > { %495 = vmatmul.f32.vlgmr.msra.gmra.mxu2 %v2345_v4  ;;  %604 = vmatpush.msrb.mxu0 %v2873_v47  ;;  %v794_v4 = vand.u32 4294901760, %v793_v24  ;;  %v697_v45 = vand.u32 4294901760, %v2442_v53  ;;  %v1047_v47 = vld [vmem:[#allocation5 + $0x138] sm:$0xff] }
  0x69   : > { %641 = vmatpush.msrb.mxu1 %v2104_v40  ;;  %688 = vmatpush.msrb.mxu2 %v2339_v14  ;;  %v805_v40 = vsub.f32 %v2408_v17, %v804_v30 }
  0x6a   : > { %539 = vmatmul.f32.vlgmr.msra.gmra.mxu3 %v325_v2  ;;  %608 = vmatpush.msrb.mxu0 %v2874_v38  ;;  %v800_v2 = vand.u32 4294901760, %v799_v11 }
  0x6b   : > { %643 = vmatpush.msrb.mxu1 %v2115_v46  ;;  %690 = vmatpush.msrb.mxu2 %v2355_v60  ;;  %v806_v46 = vand.u32 4294901760, %v805_v40 }
  0x6c   : > { %789 = vmatpush.msrb.mxu3 %v788_v28  ;;  %437 = vmatmul.f32.vlgmr.msra.gmra.mxu1 %v2321_v23 }
  0x6d   : > { %612 = vmatpush.msrb.mxu0 %v2875_v49  ;;  %645 = vmatpush.msrb.mxu1 %v2126_v51  ;;  %v698_v51 = vsub.f32 %v2442_v53, %v697_v45 }
  0x6e   : > { %692 = vmatpush.msrb.mxu2 %v2367_v16  ;;  %795 = vmatpush.msrb.mxu3 %v794_v4  ;;  %v1046_v4 = vld [vmem:[#allocation5 + $0x130] sm:$0xff] }
  0x6f   : > { %819 = vmatpush.msra.mxu0 %v2184_v42  ;;  %647 = vmatpush.msrb.mxu1 %v2138_v57  ;;  %v2877_v57 = vand.u32 4294901760, %v2202_v55  ;;  %v2878_v42 = vld [vmem:[#allocation12_spill] sm:$0xff] }
  0x70   : > { %694 = vmatpush.msrb.mxu2 %v2385_v10  ;;  %801 = vmatpush.msrb.mxu3 %v800_v2  ;;  %v1045_v2 = vld [vmem:[#allocation5 + $0x128] sm:$0xff] }
  0x71   : > { %500 = vmatmul.f32.gmra.mxu2 %v332_v56  ;;  %822 = vmatpush.msra.mxu0 %v2202_v55  ;;  %v699_v56 = vand.u32 4294901760, %v698_v51  ;;  %v2881_v55 = vand.u32 4294901760, %v2878_v42  ;;  %v1044_v51 = vld [vmem:[#allocation5 + $0x120] sm:$0xff] }
  0x72   : > { %924 = vmatpush.msra.mxu2 %v2876_v54  ;;  %649 = vmatpush.msrb.mxu1 %v2150_v0  ;;  %v2879_v0 = vand.u32 4294901760, %v2215_v6 }
  0x73   : > { %807 = vmatpush.msrb.mxu3 %v806_v46  ;;  %336 = vmatmul.f32.gmra.mxu0 %v335_v59  ;;  %v2609_v59 = vand.u32 4294901760, %v1046_v4 }
  0x74   : > { %545 = vmatmul.f32.gmra.mxu3 %v333_v13  ;;  %825 = vmatpush.msra.mxu0 %v2215_v6  ;;  %v2882_v6 = vand.u32 4294901760, %v2248_v35 }
  0x75   : > { %928 = vmatpush.msra.mxu2 %v2877_v57  ;;  %995 = vmatpush.msra.mxu3 %v2155_v8 }
  0x76   : > { %651 = vmatpush.msrb.mxu1 %v2164_v18  ;;  %828 = vmatpush.msra.mxu0 %v2878_v42  ;;  %v2478_v18 = vand.u32 4294901760, %v253_v22 }
  0x77   : > { %441 = vmatmul.f32.gmra.mxu1 %v2387_v34  ;;  %932 = vmatpush.msra.mxu2 %v2879_v0  ;;  %v1043_v0 = vld [vmem:[#allocation5 + $0x118] sm:$0xff] }
  0x78   : > { %997 = vmatpush.msra.mxu3 %v2171_v32  ;;  %653 = vmatpush.msrb.mxu1 %v2880_v63  ;;  %v2491_v15 = vsub.f32 %v253_v22, %v2478_v18  ;;  %v1160_v22 = vsub.f32 %v1046_v4, %v2609_v59 }
  0x79   : > { %831 = vmatpush.msra.mxu0 %v2248_v35  ;;  %936 = vmatpush.msra.mxu2 %v2881_v55  ;;  %v2884_v35 = vand.u32 4294901760, %v2276_v48  ;;  %v2626_v55 = vand.u32 4294901760, %v1044_v51 }
  0x7a   : > { %877 = vmatpush.msra.mxu1 %v2155_v8  ;;  %999 = vmatpush.msra.mxu3 %v2186_v43  ;;  %v2883_v8 = vand.u32 4294901760, %v2263_v26 }
  0x7b   : > { %700 = vmatmul.f32.vlgmr.msrb.gmra.mxu2 %v699_v56  ;;  %834 = vmatpush.msra.mxu0 %v2263_v26  ;;  %v705_v26 = vand.u32 4294901760, %v2491_v15 }
  0x7c   : > { %879 = vmatpush.msra.mxu1 %v2171_v32  ;;  %940 = vmatpush.msra.mxu2 %v2882_v6  ;;  %v2885_v32 = vand.u32 4294901760, %v2289_v12 }
  0x7d   : > { %1001 = vmatpush.msra.mxu3 %v2209_v7  ;;  %614 = vmatmul.f32.vlgmr.msrb.gmra.mxu0 %v2321_v23 }
  0x7e   : > { %809 = vmatmul.f32.vlgmr.msrb.gmra.mxu3 %v2427_v1  ;;  %837 = vmatpush.msra.mxu0 %v2276_v48 }
  0x7f   : > { %881 = vmatpush.msra.mxu1 %v2186_v43  ;;  %944 = vmatpush.msra.mxu2 %v2883_v8  ;;  %v2886_v43 = vand.u32 4294901760, %v2301_v62 }
  0x80   : > { %1003 = vmatpush.msra.mxu3 %v2222_v29  ;;  %655 = vmatmul.f32.vlgmr.msrb.gmra.mxu1 %v2321_v23 }
  0x81   : > { %840 = vmatpush.msra.mxu0 %v2289_v12  ;;  %883 = vmatpush.msra.mxu1 %v2209_v7  ;;  %v2887_v7 = vand.u32 4294901760, %v2329_v20  ;;  %v1054_v12 = vld [vmem:[#allocation5 + $0x170] sm:$0xff] }
  0x82   : > { %948 = vmatpush.msra.mxu2 %v2884_v35  ;;  %1005 = vmatpush.msra.mxu3 %v2235_v52 }
  0x83   : > { %843 = vmatpush.msra.mxu0 %v2301_v62  ;;  %885 = vmatpush.msra.mxu1 %v2222_v29  ;;  %v706_v29 = vsub.f32 %v2491_v15, %v705_v26  ;;  %v1052_v62 = vld [vmem:[#allocation5 + $0x160] sm:$0xff] }
  0x84   : > { %952 = vmatpush.msra.mxu2 %v2885_v32  ;;  %1007 = vmatpush.msra.mxu3 %v2250_v33 }
  0x85   : > { %846 = vmatpush.msra.mxu0 %v2314_v37  ;;  %887 = vmatpush.msra.mxu1 %v2235_v52  ;;  %v1055_v52 = vld [vmem:[#allocation5 + $0x178] sm:$0xff] }
  0x86   : > { %956 = vmatpush.msra.mxu2 %v2886_v43  ;;  %1009 = vmatpush.msra.mxu3 %v2265_v25  ;;  %v2529_v48 = vand.u32 4294901760, %v1055_v52  ;;  %v2634_v43 = vand.u32 4294901760, %v1043_v0 }
  0x87   : > { %849 = vmatpush.msra.mxu0 %v2329_v20  ;;  %889 = vmatpush.msra.mxu1 %v2250_v33  ;;  %v707_v33 = vand.u32 4294901760, %v706_v29  ;;  %v1042_v29 = vld [vmem:[#allocation5 + $0x110] sm:$0xff] }
  0x88   : > { %960 = vmatpush.msra.mxu2 %v768_v36  ;;  %1011 = vmatpush.msra.mxu3 %v2278_v39  ;;  %v1106_v37 = vsub.f32 %v1055_v52, %v2529_v48  ;;  %v2550_v36 = vand.u32 4294901760, %v1052_v62 }
  0x89   : > { %852 = vmatpush.msra.mxu0 %v2348_v21  ;;  %891 = vmatpush.msra.mxu1 %v2265_v25  ;;  %v1053_v25 = vld [vmem:[#allocation5 + $0x168] sm:$0xff] }
  0x8a   : > { %964 = vmatpush.msra.mxu2 %v2887_v7  ;;  %1013 = vmatpush.msra.mxu3 %v2291_v31  ;;  %v2542_v23 = vand.u32 4294901760, %v1053_v25  ;;  %v2638_v7 = vand.u32 4294901760, %v1160_v22 }
  0x8b   : > { %618 = vmatmul.f32.gmra.mxu0 %v2387_v34  ;;  %893 = vmatpush.msra.mxu1 %v2278_v39  ;;  %v2536_v39 = vand.u32 4294901760, %v1054_v12 }
  0x8c   : > { %855 = vmatpush.msra.mxu0 %v2365_v44  ;;  %968 = vmatpush.msra.mxu2 %v780_v9  ;;  %v1118_v21 = vsub.f32 %v1053_v25, %v2542_v23  ;;  %v1050_v9 = vld [vmem:[#allocation5 + $0x150] sm:$0xff]  ;;  %v1041_v25 = vld [vmem:[#allocation5 + $0x108] sm:$0xff] }
  0x8d   : > { %1015 = vmatpush.msra.mxu3 %v2303_v61  ;;  %895 = vmatpush.msra.mxu1 %v2291_v31  ;;  %v1051_v31 = vld [vmem:[#allocation5 + $0x158] sm:$0xff]  ;;  %v1112_v20 = vsub.f32 %v1054_v12, %v2536_v39  ;;  %v1172_v12 = vsub.f32 %v1044_v51, %v2626_v55 }
  0x8e   : > { %858 = vmatpush.msra.mxu0 %v2380_v5  ;;  %972 = vmatpush.msra.mxu2 %v786_v3  ;;  %v2560_v44 = vand.u32 4294901760, %v1051_v31  ;;  %v1049_v5 = vld [vmem:[#allocation5 + $0x148] sm:$0xff] }
  0x8f   : > { %1017 = vmatpush.msra.mxu3 %v2319_v19  ;;  %708 = vmatmul.f32.gmra.mxu2 %v707_v33 }
  0x90   : > { %861 = vmatpush.msra.mxu0 %v2392_v27  ;;  %897 = vmatpush.msra.mxu1 %v2303_v61  ;;  %v2557_v61 = vand.u32 4294901760, %v1106_v37  ;;  %v1124_v27 = vsub.f32 %v1052_v62, %v2550_v36  ;;  %v2645_v62 = vand.u32 4294901760, %v1042_v29 }
  0x91   : > { %976 = vmatpush.msra.mxu2 %v792_v58  ;;  %1019 = vmatpush.msra.mxu3 %v2339_v14  ;;  %v1130_v58 = vsub.f32 %v1051_v31, %v2560_v44 }
  0x92   : > { %813 = vmatmul.f32.gmra.mxu3 %v2478_v18  ;;  %864 = vmatpush.msra.mxu0 %v2408_v17  ;;  %v1108_v3 = vsub.f32 %v1106_v37, %v2557_v61  ;;  %v1048_v17 = vld [vmem:[#allocation5 + $0x140] sm:$0xff]  ;;  %v2584_v24 = vand.u32 4294901760, %v1124_v27 }
  0x93   : > { %899 = vmatpush.msra.mxu1 %v2319_v19  ;;  %980 = vmatpush.msra.mxu2 %v798_v41  ;;  %v2567_v19 = vand.u32 4294901760, %v1112_v20  ;;  %v2581_v41 = vand.u32 4294901760, %v1049_v5  ;;  %v2590_v13 = vand.u32 4294901760, %v1048_v17  ;;  %v2594_v11 = vand.u32 4294901760, %v1130_v58 }
  0x94   : > { %1021 = vmatpush.msra.mxu3 %v2355_v60  ;;  %659 = vmatmul.f32.gmra.mxu1 %v2387_v34  ;;  %v2571_v34 = vand.u32 4294901760, %v1050_v9  ;;  %v1109_v28 = vand.u32 4294901760, %v1108_v3  ;;  %v1126_v50 = vsub.f32 %v1124_v27, %v2584_v24 }
  0x95   : > { %867 = vmatmul.f32.vlgmr.msra.gmra.mxu0 %v2442_v53  ;;  %901 = vmatpush.msra.mxu1 %v2339_v14  ;;  %v2575_v14 = vand.u32 4294901760, %v1118_v21  ;;  %v1142_v40 = vsub.f32 %v1049_v5, %v2581_v41  ;;  %v1148_v46 = vsub.f32 %v1048_v17, %v2590_v13  ;;  %v1132_v54 = vsub.f32 %v1130_v58, %v2594_v11 }
  0x96   : > { %1057 = vmatpush.msrb.mxu0 %v2529_v48  ;;  %984 = vmatpush.msra.mxu2 %v804_v30  ;;  %v1136_v30 = vsub.f32 %v1050_v9, %v2571_v34  ;;  %v1127_v42 = vand.u32 4294901760, %v1126_v50  ;;  %v2653_v9 = vand.u32 4294901760, %v1041_v25  ;;  %v1184_v5 = vsub.f32 %v1042_v29, %v2645_v62 }
  0x97   : > { %1023 = vmatpush.msra.mxu3 %v2367_v16  ;;  %903 = vmatpush.msra.mxu1 %v2355_v60  ;;  %v1114_v60 = vsub.f32 %v1112_v20, %v2567_v19  ;;  %v1120_v38 = vsub.f32 %v1118_v21, %v2575_v14  ;;  %v2614_v57 = vand.u32 4294901760, %v1142_v40  ;;  %v2622_v56 = vand.u32 4294901760, %v1148_v46 }
  0x98   : > { %1212 = vmatpush.msrb.mxu2 %v1106_v37  ;;  %1059 = vmatpush.msrb.mxu0 %v2536_v39  ;;  %v2606_v49 = vand.u32 4294901760, %v1136_v30  ;;  %v1133_v6 = vand.u32 4294901760, %v1132_v54 }
  0x99   : > { %1025 = vmatpush.msra.mxu3 %v2385_v10  ;;  %986 = vmatmul.f32.vlgmr.msra.gmra.mxu2 %v2427_v1  ;;  %v1144_v35 = vsub.f32 %v1142_v40, %v2614_v57  ;;  %v1150_v33 = vsub.f32 %v1148_v46, %v2622_v56 }
  0x9a   : > { %1061 = vmatpush.msrb.mxu0 %v2542_v23  ;;  %1215 = vmatpush.msrb.mxu2 %v1112_v20  ;;  %v1138_v63 = vsub.f32 %v1136_v30, %v2606_v49  ;;  %v1178_v20 = vsub.f32 %v1043_v0, %v2634_v43 }
  0x9b   : > { %1270 = vmatpush.msrb.mxu3 %v2529_v48  ;;  %905 = vmatpush.msra.mxu1 %v2367_v16  ;;  %v2599_v16 = vand.u32 4294901760, %v1047_v47 }
  0x9c   : > { %1027 = vmatmul.f32.vlgmr.msra.gmra.mxu3 %v2427_v1  ;;  %1063 = vmatpush.msrb.mxu0 %v2550_v36  ;;  %v1115_v1 = vand.u32 4294901760, %v1114_v60  ;;  %v1139_v52 = vand.u32 4294901760, %v1138_v63  ;;  %v2664_v17 = vand.u32 4294901760, %v1178_v20 }
  0x9d   : > { %1218 = vmatpush.msrb.mxu2 %v1118_v21  ;;  %1272 = vmatpush.msrb.mxu3 %v2536_v39  ;;  %v1154_v53 = vsub.f32 %v1047_v47, %v2599_v16  ;;  %v1040_v21 = vld [vmem:[#allocation5 + $0x100] sm:$0xff]  ;;  %v1190_v47 = vsub.f32 %v1041_v25, %v2653_v9 }
  0x9e   : > { %907 = vmatpush.msra.mxu1 %v2385_v10  ;;  %1065 = vmatpush.msrb.mxu0 %v2560_v44  ;;  %v1121_v10 = vand.u32 4294901760, %v1120_v38  ;;  %v2661_v3 = vand.u32 4294901760, %v1040_v21  ;;  %v2672_v38 = vand.u32 4294901760, %v1184_v5 }
  0x9f   : > { %911 = vmatmul.f32.vlgmr.msra.gmra.mxu1 %v697_v45  ;;  %1221 = vmatpush.msrb.mxu2 %v1124_v27  ;;  %v2617_v45 = vand.u32 4294901760, %v1045_v2  ;;  %v2630_v8 = vand.u32 4294901760, %v1154_v53  ;;  %v1162_v27 = vsub.f32 %v1160_v22, %v2638_v7  ;;  %v2678_v50 = vand.u32 4294901760, %v1190_v47 }
  0xa0   : > { %1110 = vmatpush.msrb.mxu1 %v1109_v28  ;;  %1274 = vmatpush.msrb.mxu3 %v2542_v23  ;;  %v1196_v4 = vsub.f32 %v1040_v21, %v2661_v3  ;;  %v1186_v54 = vsub.f32 %v1184_v5, %v2672_v38 }
  0xa1   : > { %1067 = vmatpush.msrb.mxu0 %v2571_v34  ;;  %1224 = vmatpush.msrb.mxu2 %v1130_v58  ;;  %v1166_v32 = vsub.f32 %v1045_v2, %v2617_v45  ;;  %v1156_v31 = vsub.f32 %v1154_v53, %v2630_v8  ;;  %v1613_v2 = vld [vmem:[%s2024_s22 + $0x2] sm:$0xff] }
  0xa2   : > { %1116 = vmatpush.msrb.mxu1 %v1115_v1  ;;  %1276 = vmatpush.msrb.mxu3 %v2550_v36  ;;  %v1180_v1 = vsub.f32 %v1178_v20, %v2664_v17  ;;  %v1187_v0 = vand.u32 4294901760, %v1186_v54 }
  0xa3   : > { %872 = vmatmul.f32.gmra.mxu0 %v2491_v15  ;;  %990 = vmatmul.f32.gmra.mxu2 %v2478_v18  ;;  %v2648_v37 = vand.u32 4294901760, %v1166_v32  ;;  %v1151_v15 = vand.u32 4294901760, %v1150_v33  ;;  %v1157_v58 = vand.u32 4294901760, %v1156_v31 }
  0xa4   : > { %1069 = vmatpush.msrb.mxu0 %v2581_v41  ;;  %1122 = vmatpush.msrb.mxu1 %v1121_v10  ;;  %v2683_v10 = vand.u32 4294901760, %v1196_v4  ;;  %v1181_v51 = vand.u32 4294901760, %v1180_v1 }
  0xa5   : > { %1227 = vmatpush.msrb.mxu2 %v1136_v30  ;;  %1278 = vmatpush.msrb.mxu3 %v2560_v44  ;;  %v1168_v60 = vsub.f32 %v1166_v32, %v2648_v37  ;;  %v1163_v30 = vand.u32 4294901760, %v1162_v27 }
  0xa6   : > { %1031 = vmatmul.f32.gmra.mxu3 %v2478_v18  ;;  %1071 = vmatpush.msrb.mxu0 %v2590_v13  ;;  %v1145_v18 = vand.u32 4294901760, %v1144_v35  ;;  %v1198_v63 = vsub.f32 %v1196_v4, %v2683_v10 }
  0xa7   : > { %1128 = vmatpush.msrb.mxu1 %v1127_v42  ;;  %1230 = vmatpush.msrb.mxu2 %v1142_v40  ;;  %v1169_v40 = vand.u32 4294901760, %v1168_v60  ;;  %v1192_v42 = vsub.f32 %v1190_v47, %v2678_v50 }
  0xa8   : > { %1280 = vmatpush.msrb.mxu3 %v2571_v34  ;;  %917 = vmatmul.f32.gmra.mxu1 %v705_v26  ;;  %v2656_v26 = vand.u32 4294901760, %v1172_v12  ;;  %v1199_v35 = vand.u32 4294901760, %v1198_v63 }
  0xa9   : > { %1073 = vmatpush.msrb.mxu0 %v2599_v16  ;;  %1134 = vmatpush.msrb.mxu1 %v1133_v6  ;;  %v1193_v6 = vand.u32 4294901760, %v1192_v42 }
  0xaa   : > { %1233 = vmatpush.msrb.mxu2 %v1148_v46  ;;  %1282 = vmatpush.msrb.mxu3 %v2581_v41  ;;  %v1174_v28 = vsub.f32 %v1172_v12, %v2656_v26 }
  0xab   : > { %1075 = vmatpush.msrb.mxu0 %v2609_v59  ;;  %1140 = vmatpush.msrb.mxu1 %v1139_v52 }
  0xac   : > { %1236 = vmatpush.msrb.mxu2 %v1154_v53  ;;  %1284 = vmatpush.msrb.mxu3 %v2590_v13  ;;  %v1175_v46 = vand.u32 4294901760, %v1174_v28  ;;  %v2687_v53 = vand.u32 4294901760, %v1613_v2 }
  0xad   : > { %1077 = vmatpush.msrb.mxu0 %v2617_v45  ;;  %1146 = vmatpush.msrb.mxu1 %v1145_v18 }
  0xae   : > { %1239 = vmatpush.msrb.mxu2 %v1160_v22  ;;  %1286 = vmatpush.msrb.mxu3 %v2599_v16  ;;  %v1089_v22 = vsub.f32 %v1613_v2, %v2687_v53 }
  0xaf   : > { %1079 = vmatpush.msrb.mxu0 %v2626_v55  ;;  %1152 = vmatpush.msrb.mxu1 %v1151_v15 }
  0xb0   : > { %1242 = vmatpush.msrb.mxu2 %v1166_v32  ;;  %1288 = vmatpush.msrb.mxu3 %v2609_v59  ;;  %v1614_v32 = vld [vmem:[%s2024_s22 + $0xa] sm:$0xff]  ;;  %v1090_v29 = vand.u32 4294901760, %v1089_v22 }
  0xb1   : > { %1081 = vmatpush.msrb.mxu0 %v2634_v43  ;;  %1158 = vmatpush.msrb.mxu1 %v1157_v58 }
  0xb2   : > { %1245 = vmatpush.msrb.mxu2 %v1172_v12  ;;  %1290 = vmatpush.msrb.mxu3 %v2617_v45 }
  0xb3   : > { %1083 = vmatpush.msrb.mxu0 %v2645_v62  ;;  %1164 = vmatpush.msrb.mxu1 %v1163_v30 }
  0xb4   : > { %1248 = vmatpush.msrb.mxu2 %v1178_v20  ;;  %1292 = vmatpush.msrb.mxu3 %v2626_v55 }
  0xb5   : > { %1085 = vmatpush.msrb.mxu0 %v2653_v9  ;;  %1170 = vmatpush.msrb.mxu1 %v1169_v40 }
  0xb6   : > { %1251 = vmatpush.msrb.mxu2 %v1184_v5  ;;  %1294 = vmatpush.msrb.mxu3 %v2634_v43 }
  0xb7   : > { %1087 = vmatpush.msrb.mxu0 %v2661_v3  ;;  %1176 = vmatpush.msrb.mxu1 %v1175_v46 }
  0xb8   : > { %1254 = vmatpush.msrb.mxu2 %v1190_v47  ;;  %1296 = vmatpush.msrb.mxu3 %v2645_v62 }
  0xb9   : > { %1317 = vmatpush.msra.mxu0 %v2557_v61  ;;  %1182 = vmatpush.msrb.mxu1 %v1181_v51 }
  0xba   : > { %1257 = vmatpush.msrb.mxu2 %v1196_v4  ;;  %1298 = vmatpush.msrb.mxu3 %v2653_v9 }
  0xbb   : > { %1321 = vmatpush.msra.mxu0 %v2567_v19  ;;  %1188 = vmatpush.msrb.mxu1 %v1187_v0 }
  0xbc   : > { %1621 = vmatpush.msra.mxu2 %v2557_v61  ;;  %1300 = vmatpush.msrb.mxu3 %v2661_v3  ;;  %v2706_v61 = vand.u32 4294901760, %v1614_v32 }
  0xbd   : > { %1325 = vmatpush.msra.mxu0 %v2575_v14  ;;  %1194 = vmatpush.msrb.mxu1 %v1193_v6 }
  0xbe   : > { %1622 = vmatpush.msra.mxu2 %v2567_v19  ;;  %1637 = vmatpush.msra.mxu3 %v2529_v48  ;;  %v1091_v19 = vsub.f32 %v1089_v22, %v1090_v29 }
  0xbf   : > { %1329 = vmatpush.msra.mxu0 %v2584_v24  ;;  %1200 = vmatpush.msrb.mxu1 %v1199_v35 }
  0xc0   : > { %1623 = vmatpush.msra.mxu2 %v2575_v14  ;;  %1638 = vmatpush.msra.mxu3 %v2536_v39  ;;  %v1097_v14 = vsub.f32 %v1614_v32, %v2706_v61 }
  0xc1   : > { %1333 = vmatpush.msra.mxu0 %v2594_v11  ;;  %1388 = vmatpush.msra.mxu1 %v2529_v48 }
  0xc2   : > { %1624 = vmatpush.msra.mxu2 %v2584_v24  ;;  %1639 = vmatpush.msra.mxu3 %v2542_v23  ;;  %v1092_v24 = vand.u32 4294901760, %v1091_v19  ;;  %v1098_v48 = vand.u32 4294901760, %v1097_v14 }
  0xc3   : > { %1337 = vmatpush.msra.mxu0 %v2606_v49  ;;  %1390 = vmatpush.msra.mxu1 %v2536_v39 }
  0xc4   : > { %1625 = vmatpush.msra.mxu2 %v2594_v11  ;;  %1640 = vmatpush.msra.mxu3 %v2550_v36  ;;  %v1099_v39 = vsub.f32 %v1097_v14, %v1098_v48 }
  0xc5   : > { %1341 = vmatpush.msra.mxu0 %v2614_v57  ;;  %1392 = vmatpush.msra.mxu1 %v2542_v23 }
  0xc6   : > { %1626 = vmatpush.msra.mxu2 %v2606_v49  ;;  %1641 = vmatpush.msra.mxu3 %v2560_v44  ;;  %v1100_v23 = vand.u32 4294901760, %v1099_v39 }
  0xc7   : > { %1345 = vmatpush.msra.mxu0 %v2622_v56  ;;  %1394 = vmatpush.msra.mxu1 %v2550_v36 }
  0xc8   : > { %1627 = vmatpush.msra.mxu2 %v2614_v57  ;;  %1642 = vmatpush.msra.mxu3 %v2571_v34 }
  0xc9   : > { %1093 = vmatmul.f32.vlgmr.msrb.gmra.mxu0 %v1092_v24  ;;  %1396 = vmatpush.msra.mxu1 %v2560_v44 }
  0xca   : > { %1628 = vmatpush.msra.mxu2 %v2622_v56  ;;  %1349 = vmatpush.msra.mxu0 %v2630_v8 }
  0xcb   : > { %1643 = vmatpush.msra.mxu3 %v2581_v41  ;;  %1260 = vmatmul.f32.vlgmr.msrb.gmra.mxu2 %v1089_v22 }
  0xcc   : > { %1629 = vmatpush.msra.mxu2 %v2630_v8  ;;  %1353 = vmatpush.msra.mxu0 %v2638_v7 }
  0xcd   : > { %1398 = vmatpush.msra.mxu1 %v2571_v34  ;;  %1644 = vmatpush.msra.mxu3 %v2590_v13 }
  0xce   : > { %1304 = vmatmul.f32.vlgmr.msrb.gmra.mxu3 %v1090_v29  ;;  %1630 = vmatpush.msra.mxu2 %v2638_v7 }
  0xcf   : > { %1357 = vmatpush.msra.mxu0 %v2648_v37  ;;  %1400 = vmatpush.msra.mxu1 %v2581_v41 }
  0xd0   : > { %1645 = vmatpush.msra.mxu3 %v2599_v16  ;;  %1202 = vmatmul.f32.vlgmr.msrb.gmra.mxu1 %v2687_v53 }
  0xd1   : > { %1631 = vmatpush.msra.mxu2 %v2648_v37  ;;  %1361 = vmatpush.msra.mxu0 %v2656_v26 }
  0xd2   : > { %1402 = vmatpush.msra.mxu1 %v2590_v13  ;;  %1646 = vmatpush.msra.mxu3 %v2609_v59 }
  0xd3   : > { %1101 = vmatmul.f32.gmra.mxu0 %v1100_v23  ;;  %1632 = vmatpush.msra.mxu2 %v2656_v26 }
  0xd4   : > { %1365 = vmatpush.msra.mxu0 %v2664_v17  ;;  %1404 = vmatpush.msra.mxu1 %v2599_v16 }
  0xd5   : > { %1647 = vmatpush.msra.mxu3 %v2617_v45  ;;  %1265 = vmatmul.f32.gmra.mxu2 %v1097_v14 }
  0xd6   : > { %1633 = vmatpush.msra.mxu2 %v2664_v17  ;;  %1369 = vmatpush.msra.mxu0 %v2672_v38 }
  0xd7   : > { %1406 = vmatpush.msra.mxu1 %v2609_v59  ;;  %1648 = vmatpush.msra.mxu3 %v2626_v55 }
  0xd8   : > { %1310 = vmatmul.f32.gmra.mxu3 %v1098_v48  ;;  %1634 = vmatpush.msra.mxu2 %v2672_v38 }
  0xd9   : > { %1373 = vmatpush.msra.mxu0 %v2678_v50  ;;  %1408 = vmatpush.msra.mxu1 %v2617_v45 }
  0xda   : > { %1649 = vmatpush.msra.mxu3 %v2634_v43  ;;  %1206 = vmatmul.f32.gmra.mxu1 %v2706_v61 }
  0xdb   : > { %1635 = vmatpush.msra.mxu2 %v2678_v50  ;;  %1377 = vmatpush.msra.mxu0 %v2683_v10 }
  0xdc   : > { %1410 = vmatpush.msra.mxu1 %v2626_v55  ;;  %1650 = vmatpush.msra.mxu3 %v2645_v62 }
  0xdd   : > { %1379 = vmatmul.f32.vlgmr.msra.gmra.mxu0 %v2687_v53  ;;  %1636 = vmatpush.msra.mxu2 %v2683_v10 }
  0xde   : > { %1412 = vmatpush.msra.mxu1 %v2634_v43  ;;  %1651 = vmatpush.msra.mxu3 %v2653_v9 }
  0xdf   : > { %1383 = vmatmul.f32.vlgmr.msra.gmra.mxu2 %v2706_v61 }
  0xe0   : > { %1414 = vmatpush.msra.mxu1 %v2645_v62  ;;  %1652 = vmatpush.msra.mxu3 %v2661_v3 }
  0xe1   : > { %1424 = vmatmul.f32.vlgmr.msra.gmra.mxu3 %v2706_v61 }
  0xe2   : > { %1416 = vmatpush.msra.mxu1 %v2653_v9  ;;  %v329_v36 = vpop.f32.mrf.mxu0 }
  0xe4   : > { %1418 = vmatpush.msra.mxu1 %v2661_v3 }
  0xe5   : > { %1420 = vmatmul.f32.vlgmr.msra.gmra.mxu1 %v2687_v53 }
  0xe9   : > { %v438_v44 = vpop.f32.mrf.mxu1 }
  0xea   : > { %v439_v25 = vadd.f32 %v438_v44, %v329_v36  ;;  %v1733_v44 = vld [vmem:[%s2818_s2] ss:$0 sm:$0xff] }
  0xeb   : > { %v496_v34 = vpop.f32.mrf.mxu2 }
  0xec   : > { %v497_v31 = vadd.f32 %v496_v34, %v439_v25 }
  0xed   : > { %v540_v41 = vpop.f32.mrf.mxu3 }
  0xee   : > { %v541_v15 = vadd.f32 %v540_v41, %v497_v31 }
  0xf0   : > { %v337_v13 = vpop.f32.mrf.mxu0 }
  0xf4   : > { %v442_v11 = vpop.f32.mrf.mxu1  ;;  %v501_v16 = vpop.f32.mrf.mxu2 }
  0xf5   : > { %v443_v62 = vadd.f32 %v442_v11, %v337_v13  ;;  %v1734_v11 = vld [vmem:[%s2819_s3] ss:$0 sm:$0xff] }
  0xf7   : > { %v546_v49 = vpop.f32.mrf.mxu3  ;;  %v502_v20 = vadd.f32 %v501_v16, %v443_v62 }
  0xf9   : > { %v547_v26 = vadd.f32 %v546_v49, %v502_v20 }
  0xfa   : > { %v615_v59 = vpop.f32.mrf.mxu0 }
  0xfb   : > { %v616_v3 = vadd.f32 %v615_v59, %v541_v15 }
  0xfd   : > { %v656_v57 = vpop.f32.mrf.mxu1 }
  0xfe   : > { %v701_v45 = vpop.f32.mrf.mxu2  ;;  %v657_v47 = vadd.f32 %v656_v57, %v616_v3 }
 0x100   : > { %v702_v38 = vadd.f32 %v701_v45, %v657_v47 }
 0x101   : > { %v810_v56 = vpop.f32.mrf.mxu3 }
 0x102   : > { %v811_v1 = vadd.f32 %v810_v56, %v702_v38 }
 0x108   : > { %v619_v55 = vpop.f32.mrf.mxu0 }
 0x109   : > { %v620_v58 = vadd.f32 %v619_v55, %v547_v26 }
 0x111   : > { %v660_v8 = vpop.f32.mrf.mxu1 }
 0x112   : > { %v709_v43 = vpop.f32.mrf.mxu2  ;;  %v868_v7 = vpop.f32.mrf.mxu0  ;;  %v661_v30 = vadd.f32 %v660_v8, %v620_v58 }
 0x113   : > { %v869_v54 = vadd.f32 %v868_v7, %v811_v1 }
 0x114   : > { %v710_v4 = vadd.f32 %v709_v43, %v661_v30 }
 0x115   : > { %v814_v52 = vpop.f32.mrf.mxu3 }
 0x116   : > { %v815_v50 = vadd.f32 %v814_v52, %v710_v4 }
 0x11c   : > { %v912_v33 = vpop.f32.mrf.mxu1  ;;  %v987_v12 = vpop.f32.mrf.mxu2 }
 0x11d   : > { %v913_v53 = vadd.f32 %v912_v33, %v869_v54 }
 0x11f   : > { %v1028_v18 = vpop.f32.mrf.mxu3  ;;  %v988_v32 = vadd.f32 %v987_v12, %v913_v53 }
 0x120   : > { %v873_v37 = vpop.f32.mrf.mxu0 }
 0x121   : > { %v874_v42 = vadd.f32 %v873_v37, %v815_v50  ;;  %v1029_v39 = vadd.f32 %v1028_v18, %v988_v32 }
 0x125   : > { %v918_v21 = vpop.f32.mrf.mxu1 }
 0x126   : > { %v991_v9 = vpop.f32.mrf.mxu2  ;;  %v919_v22 = vadd.f32 %v918_v21, %v874_v42 }
 0x128   : > { %v992_v61 = vadd.f32 %v991_v9, %v919_v22 }
 0x129   : > { %v1032_v27 = vpop.f32.mrf.mxu3 }
 0x12a   : > { %v1033_v41 = vadd.f32 %v1032_v27, %v992_v61 }
 0x146   : > { %v1094_v5 = vpop.f32.mrf.mxu0 }
 0x14d   : > { %v1203_v17 = vpop.f32.mrf.mxu1 }
 0x14e   : > { %v1261_v60 = vpop.f32.mrf.mxu2  ;;  %v1204_v2 = vadd.f32 %v1203_v17, %v1094_v5 }
 0x150   : > { %v1102_v40 = vpop.f32.mrf.mxu0  ;;  %v1262_v0 = vadd.f32 %v1261_v60, %v1204_v2 }
 0x151   : > { %v1305_v28 = vpop.f32.mrf.mxu3 }
 0x152   : > { %v1306_v29 = vadd.f32 %v1305_v28, %v1262_v0 }
 0x157   : > { %v1207_v46 = vpop.f32.mrf.mxu1 }
 0x158   : > { %v1266_v10 = vpop.f32.mrf.mxu2  ;;  %v1208_v51 = vadd.f32 %v1207_v46, %v1102_v40 }
 0x15a   : > { %v1267_v6 = vadd.f32 %v1266_v10, %v1208_v51  ;;  %v1380_v35 = vpop.f32.mrf.mxu0 }
 0x15b   : > { %v1311_v63 = vpop.f32.mrf.mxu3  ;;  %v1381_v19 = vadd.f32 %v1380_v35, %v1306_v29 }
 0x15c   : > { %v1312_v14 = vadd.f32 %v1311_v63, %v1267_v6 }
 0x162   : > { %v1384_v24 = vpop.f32.mrf.mxu2  ;;  %v1421_v48 = vpop.f32.mrf.mxu1 }
 0x163   : > { %v1385_v23 = vadd.f32 %v1384_v24, %v1312_v14  ;;  %v1422_v36 = vadd.f32 %v1421_v48, %v1381_v19 }
 0x164   : > { %v1425_v34 = vpop.f32.mrf.mxu3 }
 0x165   : > { %v1428_v13 = vadd.f32 %v1422_v36, %v1029_v39  ;;  %v1426_v16 = vadd.f32 %v1425_v34, %v1385_v23 }
 0x167   : > { %v1434_v49 = vmul.f32 %v1733_v44, %v1428_v13  ;;  %v1429_v59 = vadd.f32 %v1426_v16, %v1033_v41 }
 0x169   : > { %v1440_v57 = vadd.f32 %v1734_v11, %v1434_v49  ;;  %v1435_v45 = vmul.f32 %v1733_v44, %v1429_v59 }
 0x16b   : > { %v1442_v56 = vsub.f32 0.0, %v1440_v57  ;;  %v1441_v55 = vadd.f32 %v1734_v11, %v1435_v45 }
 0x16d   : > { %v1444_v8 = vmul.f32 1.442695, %v1442_v56  ;;  %v1443_v43 = vsub.f32 0.0, %v1441_v55 }
 0x16f   : > { %1735 = vpow2.f32 %v1444_v8  ;;  %v1446_v52 = vmul.f32 1.442695, %v1443_v43 }
 0x171   : > { %1737 = vpow2.f32 %v1446_v52 }
 0x175   : > { %v1736_v7 = vpop.eup %1735 }
 0x176   : > { %v1448_v33 = vadd.f32 1.0, %v1736_v7 }
 0x177   : > { %v1738_v12 = vpop.eup %1737 }
 0x178   : > { %1739 = vrcp.f32 %v1448_v33  ;;  %v1449_v25 = vadd.f32 1.0, %v1738_v12  ;;  %v1461_v20 = vand.u32 2147483648, %v1448_v33  ;;  %v1459_v15 = vand.u32 2147483647, %v1448_v33 }
 0x179   : > { %vm1455_vm1 = vweird.f32 %v1448_v33 }
 0x17a   : > { %1741 = vrcp.f32 %v1449_v25  ;;  %v1475_v5 = vand.u32 2147483648, %v1449_v25  ;;  %v1462_v3 = vor.u32 1.1754944e-38, %v1461_v20  ;;  %v1473_v17 = vand.u32 2147483647, %v1449_v25 }
 0x17b   : > { %vm1460_vm4 = vcmp.eq.f32.partialorder %v1459_v15, 8.507059e+37  ;;  %vm1469_vm5 = vweird.f32 %v1449_v25 }
 0x17c   : > { %v1476_v38 = vor.u32 1.1754944e-38, %v1475_v5  ;;  %vm1474_vm7 = vcmp.eq.f32.partialorder %v1473_v17, 8.507059e+37 }
 0x17e   : > { %v1740_v62 = vpop.eup %1739 }
 0x17f   : > { %v1451_v18 = vmul.f32 %v1740_v62, %v1448_v33  ;;  %vm1456_vm0 = vweird.f32 %v1740_v62 }
 0x180   : > { %v1742_v37 = vpop.eup %1741  ;;  %vm1457_vm2 = vmor %vm1455_vm1, %vm1456_vm0 }
 0x181   : > { %v1452_v31 = vsub.f32 1.0, %v1451_v18  ;;  %v1465_v21 = vmul.f32 %v1742_v37, %v1449_v25  ;;  %vm1470_vm3 = vweird.f32 %v1742_v37 }
 0x182   : > { %vm1471_vm6 = vmor %vm1469_vm5, %vm1470_vm3 }
 0x183   : > { %v1453_v9 = vmul.f32 %v1740_v62, %v1452_v31  ;;  %v1466_v26 = vsub.f32 1.0, %v1465_v21 }
 0x185   : > { %v1454_v27 = vadd.f32 %v1740_v62, %v1453_v9  ;;  %v1467_v58 = vmul.f32 %v1742_v37, %v1466_v26 }
 0x187   : > { %v1458_v60 = vsel %vm1457_vm2, %v1740_v62, %v1454_v27  ;;  %v1468_v30 = vadd.f32 %v1742_v37, %v1467_v58 }
 0x188   : > { %v1463_v47 = vsel %vm1460_vm4, %v1462_v3, %v1458_v60 }
 0x189   : > { %v1478_v28 = vmul.f32 %v1463_v47, %v1440_v57  ;;  %v1472_v4 = vsel %vm1471_vm6, %v1742_v37, %v1468_v30 }
 0x18a   : > { %v1477_v40 = vsel %vm1474_vm7, %v1476_v38, %v1472_v4 }
 0x18b   : > { %1480 = vst [vmem:[%s248_s18] sm:$0xff] %v1478_v28  ;;  %v1479_v1 = vmul.f32 %v1477_v40, %v1441_v55 }
 0x18d   : > { %1481 = vst [vmem:[%s248_s18 + $0x8] sm:$0xff] %v1479_v1 }
 0x18e   : > { %1830 = shalt.err (!%p1827_p0)
}
 0x18f   : > { %s1894_s10 = smov 128   ;;  %s1895_s30 = smov 8  }
 0x190   : > { %1662 = dma.vmem_to_hbm [thread:$0]  (%p1999_p5), %s1498_s29, 256, %s1500_s5, %s1483_s6, %s1894_s10, %s1894_s10, %s1895_s30  }
 0x191 PF: > { %s1514_s7 = sand.u32 1, %s1869_s15   ;;  %p1673_p3 = pnand %p1606_p11, %p1970_p6 }
 0x192   : > { %s1515_s8 = scalar_lea.sflag [#allocation4], %s1514_s7 }
 0x193   : > { %p1674_p7 = pneg %p1673_p3 }
 0x195   : > { %1864 = dma.done.wait (%p1674_p7), %s1515_s8, 256  }
 0x196   : > { %1866 = vsyncadd (%p1674_p7), %s1515_s8, 4294967040  ;;  %s21_s20 = sadd.s32 1, %s1889_s20   ;;  %s2888_s15 = smov %s1873_s16 }
 0x197   : > { %p18_p9 = scmp.ge.s32.totalorder %s21_s20, 4   ;;  %s2889_s16 = smov %s1877_s17 }
 0x198   : > { %s2890_s17 = smov %s2008_s21  ;;  %s2891_s18 = smov %s1885_s19 }
 0x199   : > { %s2892_s19 = smov %s2894_s9  ;;  %20 = sbr.rel (!%p18_p9) target bundleno = 9 (0x9), region = 90 }
 0x19e   :  { %1521 = vsyncpa [#allocation3], 1 }
 0x19f   :  { %1523 = vsyncpa [#allocation3 + $0x1], 1 }
 0x1a0   :  { %1524 = vsyncpa [#allocation6], 1 }
 0x1a1   :  { %1525 = vsyncpa [#allocation4], 1 }
 0x1a2   :  { %1527 = vsyncpa [#allocation4 + $0x1], 1 }

</bundles_post_ra>
